<compile_context>
chip_gen: v7x
topology: tpu7x:2x2x1
jax: 0.10.0
libtpu: 0.0.40
codegen_flags: <defaults>
</compile_context>

<pallas_src>
import math

import jax
import jax.numpy as jnp
from jax.experimental import pallas as pl
from jax.experimental.pallas import tpu as pltpu

# ---- model hyper-parameters (small, consistent with the module) -------------
S = 8            # max_len (sequence length)
B = 2            # batch size
D = 32           # d_model
H = 4            # heads
DK = D // H      # per-head dim
M = 2048         # FeedForward middle_dim (module default)
BS = B * S       # stacked rows processed in one shot
LN_EPS = 1e-5


# ------------------------------- kernel --------------------------------------
def encoder_layer_kernel(x_ref, keep_ref, wqkv_ref, bqkv_ref, wch_ref,
                         small_ref, w1_ref, b1_ref, w2t_ref, out_ref):
    x = x_ref[...]                               # (BS, D) f32
    x_bf = x.astype(jnp.bfloat16)

    small = small_ref[...]                       # (4, D) f32 stacked operands
    bc, gamma, beta, b2 = small[0:1], small[1:2], small[2:3], small[3:4]

    # --- fused QKV projection (one MXU push, bf16 operands, f32 accumulate) --
    qkv = jnp.dot(x_bf, wqkv_ref[...],
                  preferred_element_type=jnp.float32) + bqkv_ref[...]   # (BS, 3D)
    scale = jnp.float32(1.0 / math.sqrt(DK))
    q3 = (qkv[:, 0 * D:1 * D] * scale).reshape(B, S, D)   # 1/sqrt(dk) folded in
    k3 = qkv[:, 1 * D:2 * D].reshape(B, S, D)
    v3 = qkv[:, 2 * D:3 * D].reshape(B, S, D)

    keep = keep_ref[...]                         # (B, S, S) dense keep-mask
    neg_inf = jnp.float32(-1.0e9)

    # --- multi-head self-attention (static head loop, B-batched einsums) -----
    attn_acc = None
    for h in range(H):
        lo = h * DK
        qh = q3[:, :, lo:lo + DK]                # (B, S, DK)
        kh = k3[:, :, lo:lo + DK]
        vh = v3[:, :, lo:lo + DK]
        s = jnp.einsum('bqd,bkd->bqk', qh, kh,
                       preferred_element_type=jnp.float32)              # (B, S, S)
        s = jnp.where(keep == 0.0, neg_inf, s)   # exact masked_fill semantics
        m = jnp.max(s, axis=-1, keepdims=True)
        e = jnp.exp(s - m)
        p = e * pl.reciprocal(jnp.sum(e, axis=-1, keepdims=True), approx=True)
        ctx_h = jnp.einsum('bqk,bkd->bqd', p, vh,
                           preferred_element_type=jnp.float32)          # (B, S, DK)
        ctx_h = ctx_h.reshape(BS, DK).astype(jnp.bfloat16)
        # no lane concat: ctx @ Wc == sum_h ctx_h @ Wc[h-th row block]
        contrib = jnp.dot(ctx_h, wch_ref[h], preferred_element_type=jnp.float32)
        attn_acc = contrib if attn_acc is None else attn_acc + contrib
    attn = attn_acc + bc                         # (BS, D) f32

    # --- shared LayerNorm (f32) -----------------------------------------------
    def layernorm(y):
        mu = jnp.mean(y, axis=-1, keepdims=True)
        var = jnp.mean((y - mu) ** 2, axis=-1, keepdims=True)
        return (y - mu) * jax.lax.rsqrt(var + LN_EPS) * gamma + beta

    interacted = layernorm(attn + x)             # (BS, D) f32

    # --- feed-forward (bf16 matmul operands, f32 elementwise) -----------------
    h1 = jnp.maximum(
        jnp.dot(interacted.astype(jnp.bfloat16), w1_ref[...],
                preferred_element_type=jnp.float32) + b1_ref[...], 0.0)  # (BS, M)
    # lane-dense w2 (D, M), contracted over its last axis  ==  h1 @ w2
    ff = jax.lax.dot_general(h1.astype(jnp.bfloat16), w2t_ref[...],
                             dimension_numbers=(((1,), (1,)), ((), ())),
                             preferred_element_type=jnp.float32) + b2    # (BS, D)

    out_ref[...] = layernorm(ff + interacted)


# ------------------------------ wrapper ---------------------------------------
def encoder_layer_pallas(embeddings, mask, params):
    """embeddings: (S, B, D) float32; mask: (B, 1, 1, S) (1 = keep, 0 = mask)."""
    x = jnp.transpose(embeddings, (1, 0, 2)).astype(jnp.float32).reshape(BS, D)
    # dense keep-mask, broadcast hoisted out of the kernel: (B, S, S)
    keep = jnp.broadcast_to(mask.reshape(B, 1, S).astype(jnp.float32), (B, S, S))

    bf = lambda a: a.astype(jnp.bfloat16)
    wqkv = bf(jnp.concatenate([params["wq"], params["wk"], params["wv"]], axis=1))
    bqkv = jnp.concatenate([params["bq"], params["bk"], params["bv"]], axis=1)
    wch = bf(params["wc"].reshape(H, DK, D))              # per-head row blocks
    small = jnp.concatenate([params["bc"], params["gamma"],
                             params["beta"], params["b2"]], axis=0)      # (4, D)
    w2t = bf(jnp.transpose(params["w2"]))                 # (D, M) lane-dense

    vmem = pl.BlockSpec(memory_space=pltpu.MemorySpace.VMEM)
    out = pl.pallas_call(
        encoder_layer_kernel,
        out_shape=jax.ShapeDtypeStruct((BS, D), jnp.float32),
        in_specs=[vmem] * 9,
        out_specs=vmem,
    )(x, keep, wqkv, bqkv, wch, small, bf(params["w1"]), params["b1"], w2t)

    return jnp.transpose(out.reshape(B, S, D), (1, 0, 2))   # back to (S, B, D)


# ------------------------- pure-JAX reference ---------------------------------
def encoder_layer_ref(embeddings, mask, p, matmul_dtype=jnp.float32):
    """matmul_dtype=f32  -> exact module semantics.
       matmul_dtype=bf16 -> mirrors the kernel's bf16-operand / f32-accumulate math."""
    c = lambda a: a.astype(matmul_dtype)
    x = jnp.transpose(embeddings, (1, 0, 2)).astype(jnp.float32)   # (B, S, D)

    def lin(a, w, b):
        return jnp.einsum('...d,de->...e', c(a), c(w),
                          preferred_element_type=jnp.float32) + b

    q = lin(x, p["wq"], p["bq"]).reshape(B, S, H, DK).transpose(0, 2, 1, 3)
    k = lin(x, p["wk"], p["bk"]).reshape(B, S, H, DK).transpose(0, 2, 1, 3)
    v = lin(x, p["wv"], p["bv"]).reshape(B, S, H, DK).transpose(0, 2, 1, 3)

    scores = jnp.einsum('bhqd,bhkd->bhqk', q, k,
                        preferred_element_type=jnp.float32) / math.sqrt(DK)
    scores = jnp.where(mask == 0, -1.0e9, scores)                  # mask (B,1,1,S)
    w = jax.nn.softmax(scores, axis=-1)
    ctx = jnp.einsum('bhqk,bhkd->bhqd', w, v,
                     preferred_element_type=jnp.float32)
    ctx = ctx.transpose(0, 2, 1, 3).reshape(B, S, D)
    attn = lin(ctx, p["wc"], p["bc"])

    def ln(y):
        mu = jnp.mean(y, axis=-1, keepdims=True)
        var = jnp.mean((y - mu) ** 2, axis=-1, keepdims=True)
        return (y - mu) * jax.lax.rsqrt(var + LN_EPS) * p["gamma"] + p["beta"]

    inter = ln(attn + x)
    h1 = jax.nn.relu(lin(inter, p["w1"], p["b1"]))
    ff = lin(h1, p["w2"], p["b2"])
    return jnp.transpose(ln(ff + inter), (1, 0, 2))


# --------------------------------- main ---------------------------------------
def make_params(key):
    ks = jax.random.split(key, 12)
    nrm = lambda k, shape, s=0.05: (s * jax.random.normal(k, shape)).astype(jnp.float32)
    return {
        # Linear weights stored already transposed: (in, out), so y = x @ w + b
        "wq": nrm(ks[0], (D, D)), "bq": nrm(ks[1], (1, D)),
        "wk": nrm(ks[2], (D, D)), "bk": nrm(ks[3], (1, D)),
        "wv": nrm(ks[4], (D, D)), "bv": nrm(ks[5], (1, D)),
        "wc": nrm(ks[6], (D, D)), "bc": nrm(ks[7], (1, D)),
        "gamma": (1.0 + nrm(ks[8], (1, D), 0.1)).astype(jnp.float32),
        "beta": nrm(ks[9], (1, D), 0.1),
        "w1": nrm(ks[10], (D, M)), "b1": jnp.zeros((1, M), jnp.float32),
        "w2": nrm(ks[11], (M, D)), "b2": jnp.zeros((1, D), jnp.float32),
    }


if __name__ == "__main__":
    key = jax.random.PRNGKey(0)
    k_emb, k_par = jax.random.split(key)

    # embeddings: (seq, batch, d_model); mask: (batch, 1, 1, seq)
    embeddings = jax.random.normal(k_emb, (S, B, D), dtype=jnp.float32)
    mask = jnp.ones((B, 1, 1, S), dtype=jnp.int32)
    mask = mask.at[1, 0, 0, S - 3:].set(0)   # mask last 3 keys of batch element 1

    params = make_params(k_par)

    out = jax.block_until_ready(encoder_layer_pallas(embeddings, mask, params))
    assert out.shape == (S, B, D)

    # Check against a reference mirroring the kernel's precision (bf16 matmul
    # operands, f32 accumulation); tolerance allows the EUP approx-reciprocal
    # used in the softmax normalization.
    ref_bf = encoder_layer_ref(embeddings, mask, params, matmul_dtype=jnp.bfloat16)
    assert jnp.allclose(out, ref_bf, rtol=1e-2, atol=1e-2), \
        "mismatch vs bf16-matched reference"

    # Loose sanity check against the exact f32 module semantics.
    ref_f32 = encoder_layer_ref(embeddings, mask, params, matmul_dtype=jnp.float32)
    assert jnp.allclose(out, ref_f32, rtol=5e-2, atol=5e-2), \
        "mismatch vs f32 reference"

    print("KERNEL_OK")
</pallas_src>

<mosaic_0001>
module attributes {stable_mosaic.version = 11 : i64} {
  func.func @encoder_layer_kernel(%arg0: memref<16x32xf32, #tpu.memory_space<vmem>>, %arg1: memref<2x8x8xf32, #tpu.memory_space<vmem>>, %arg2: memref<32x96xbf16, #tpu.memory_space<vmem>>, %arg3: memref<1x96xf32, #tpu.memory_space<vmem>>, %arg4: memref<4x8x32xbf16, #tpu.memory_space<vmem>>, %arg5: memref<4x32xf32, #tpu.memory_space<vmem>>, %arg6: memref<32x2048xbf16, #tpu.memory_space<vmem>>, %arg7: memref<1x2048xf32, #tpu.memory_space<vmem>>, %arg8: memref<32x2048xbf16, #tpu.memory_space<vmem>>, %arg9: memref<16x32xf32, #tpu.memory_space<vmem>>) attributes {dimension_semantics = [], scalar_prefetch = 0 : i64, scratch_operands = 0 : i64, tpu.core_type = #tpu.core_type<tc>} {
    %c0 = arith.constant 0 : index
    %c0_0 = arith.constant 0 : index
    %0 = vector.load %arg0[%c0, %c0_0] : memref<16x32xf32, #tpu.memory_space<vmem>>, vector<16x32xf32>
    %1 = arith.truncf %0 : vector<16x32xf32> to vector<16x32xbf16>
    %c0_1 = arith.constant 0 : index
    %c0_2 = arith.constant 0 : index
    %2 = vector.load %arg5[%c0_1, %c0_2] : memref<4x32xf32, #tpu.memory_space<vmem>>, vector<4x32xf32>
    %3 = vector.extract_strided_slice %2 {offsets = [0, 0], sizes = [1, 32], strides = [1, 1]} : vector<4x32xf32> to vector<1x32xf32>
    %4 = vector.extract_strided_slice %2 {offsets = [1, 0], sizes = [1, 32], strides = [1, 1]} : vector<4x32xf32> to vector<1x32xf32>
    %5 = vector.extract_strided_slice %2 {offsets = [2, 0], sizes = [1, 32], strides = [1, 1]} : vector<4x32xf32> to vector<1x32xf32>
    %6 = vector.extract_strided_slice %2 {offsets = [3, 0], sizes = [1, 32], strides = [1, 1]} : vector<4x32xf32> to vector<1x32xf32>
    %c0_3 = arith.constant 0 : index
    %c0_4 = arith.constant 0 : index
    %7 = vector.load %arg2[%c0_3, %c0_4] : memref<32x96xbf16, #tpu.memory_space<vmem>>, vector<32x96xbf16>
    %cst = arith.constant dense<0.000000e+00> : vector<16x96xf32>
    %8 = tpu.matmul %1, %7, %cst {dimension_numbers = #tpu.dot_dimension_numbers<[1], [0], [0], [1], [0, 0, 1, 1], [], []>} : vector<16x32xbf16>, vector<32x96xbf16>, vector<16x96xf32> -> vector<16x96xf32>
    %c0_5 = arith.constant 0 : index
    %c0_6 = arith.constant 0 : index
    %9 = vector.load %arg3[%c0_5, %c0_6] : memref<1x96xf32, #tpu.memory_space<vmem>>, vector<1x96xf32>
    %10 = vector.broadcast %9 : vector<1x96xf32> to vector<16x96xf32>
    %11 = arith.addf %8, %10 : vector<16x96xf32>
    %12 = vector.extract_strided_slice %11 {offsets = [0, 0], sizes = [16, 32], strides = [1, 1]} : vector<16x96xf32> to vector<16x32xf32>
    %cst_7 = arith.constant 0.353553385 : f32
    %13 = vector.broadcast %cst_7 : f32 to vector<16x32xf32>
    %14 = arith.mulf %12, %13 : vector<16x32xf32>
    %15 = vector.shape_cast %14 : vector<16x32xf32> to vector<2x8x32xf32>
    %16 = vector.extract_strided_slice %11 {offsets = [0, 32], sizes = [16, 32], strides = [1, 1]} : vector<16x96xf32> to vector<16x32xf32>
    %17 = vector.shape_cast %16 : vector<16x32xf32> to vector<2x8x32xf32>
    %18 = vector.extract_strided_slice %11 {offsets = [0, 64], sizes = [16, 32], strides = [1, 1]} : vector<16x96xf32> to vector<16x32xf32>
    %19 = vector.shape_cast %18 : vector<16x32xf32> to vector<2x8x32xf32>
    %c0_8 = arith.constant 0 : index
    %c0_9 = arith.constant 0 : index
    %c0_10 = arith.constant 0 : index
    %20 = vector.load %arg1[%c0_8, %c0_9, %c0_10] : memref<2x8x8xf32, #tpu.memory_space<vmem>>, vector<2x8x8xf32>
    %21 = vector.extract_strided_slice %15 {offsets = [0, 0, 0], sizes = [2, 8, 8], strides = [1, 1, 1]} : vector<2x8x32xf32> to vector<2x8x8xf32>
    %22 = vector.extract_strided_slice %17 {offsets = [0, 0, 0], sizes = [2, 8, 8], strides = [1, 1, 1]} : vector<2x8x32xf32> to vector<2x8x8xf32>
    %23 = vector.extract_strided_slice %19 {offsets = [0, 0, 0], sizes = [2, 8, 8], strides = [1, 1, 1]} : vector<2x8x32xf32> to vector<2x8x8xf32>
    "tpu.trace_start"() <{level = 10 : i32, message = "bqd,bkd->bqk"}> : () -> ()
    %cst_11 = arith.constant dense<0.000000e+00> : vector<2x8x8xf32>
    %24 = tpu.matmul %21, %22, %cst_11 {dimension_numbers = #tpu.dot_dimension_numbers<[2], [2], [1], [1], [0, 0, 0, 1, 1, 1], [0], [0]>} : vector<2x8x8xf32>, vector<2x8x8xf32>, vector<2x8x8xf32> -> vector<2x8x8xf32>
    %cst_12 = arith.constant 0.000000e+00 : f32
    "tpu.trace_stop"() : () -> ()
    %25 = vector.broadcast %cst_12 : f32 to vector<2x8x8xf32>
    %26 = arith.cmpf oeq, %20, %25 : vector<2x8x8xf32>
    %cst_13 = arith.constant -1.000000e+09 : f32
    %27 = vector.broadcast %cst_13 : f32 to vector<2x8x8xf32>
    %28 = arith.select %26, %27, %24 : vector<2x8x8xi1>, vector<2x8x8xf32>
    %cst_14 = arith.constant dense<0xFF800000> : vector<2x8xf32>
    %29 = vector.multi_reduction <maximumf>, %28, %cst_14 [2] : vector<2x8x8xf32> to vector<2x8xf32>
    %30 = vector.shape_cast %29 : vector<2x8xf32> to vector<2x8x1xf32>
    %31 = vector.broadcast %30 : vector<2x8x1xf32> to vector<2x8x8xf32>
    %32 = arith.subf %28, %31 : vector<2x8x8xf32>
    %33 = math.exp %32 : vector<2x8x8xf32>
    %cst_15 = arith.constant dense<0.000000e+00> : vector<2x8xf32>
    %34 = vector.multi_reduction <add>, %33, %cst_15 [2] : vector<2x8x8xf32> to vector<2x8xf32>
    %35 = vector.shape_cast %34 : vector<2x8xf32> to vector<2x8x1xf32>
    %36 = tpu.reciprocal %35 {approx = true} : vector<2x8x1xf32> -> vector<2x8x1xf32>
    %37 = vector.broadcast %36 : vector<2x8x1xf32> to vector<2x8x8xf32>
    %38 = arith.mulf %33, %37 : vector<2x8x8xf32>
    "tpu.trace_start"() <{level = 10 : i32, message = "bqk,bkd->bqd"}> : () -> ()
    %cst_16 = arith.constant dense<0.000000e+00> : vector<2x8x8xf32>
    %39 = tpu.matmul %38, %23, %cst_16 {dimension_numbers = #tpu.dot_dimension_numbers<[2], [1], [1], [2], [0, 0, 0, 1, 1, 2], [0], [0]>} : vector<2x8x8xf32>, vector<2x8x8xf32>, vector<2x8x8xf32> -> vector<2x8x8xf32>
    "tpu.trace_stop"() : () -> ()
    %40 = vector.shape_cast %39 : vector<2x8x8xf32> to vector<16x8xf32>
    %41 = arith.truncf %40 : vector<16x8xf32> to vector<16x8xbf16>
    %c0_17 = arith.constant 0 : index
    %c0_18 = arith.constant 0 : index
    %c0_19 = arith.constant 0 : index
    %42 = vector.load %arg4[%c0_17, %c0_18, %c0_19] : memref<4x8x32xbf16, #tpu.memory_space<vmem>>, vector<1x8x32xbf16>
    %43 = vector.shape_cast %42 : vector<1x8x32xbf16> to vector<8x32xbf16>
    %cst_20 = arith.constant dense<0.000000e+00> : vector<16x32xf32>
    %44 = tpu.matmul %41, %43, %cst_20 {dimension_numbers = #tpu.dot_dimension_numbers<[1], [0], [0], [1], [0, 0, 1, 1], [], []>} : vector<16x8xbf16>, vector<8x32xbf16>, vector<16x32xf32> -> vector<16x32xf32>
    %45 = vector.extract_strided_slice %15 {offsets = [0, 0, 8], sizes = [2, 8, 8], strides = [1, 1, 1]} : vector<2x8x32xf32> to vector<2x8x8xf32>
    %46 = vector.extract_strided_slice %17 {offsets = [0, 0, 8], sizes = [2, 8, 8], strides = [1, 1, 1]} : vector<2x8x32xf32> to vector<2x8x8xf32>
    %47 = vector.extract_strided_slice %19 {offsets = [0, 0, 8], sizes = [2, 8, 8], strides = [1, 1, 1]} : vector<2x8x32xf32> to vector<2x8x8xf32>
    "tpu.trace_start"() <{level = 10 : i32, message = "bqd,bkd->bqk"}> : () -> ()
    %cst_21 = arith.constant dense<0.000000e+00> : vector<2x8x8xf32>
    %48 = tpu.matmul %45, %46, %cst_21 {dimension_numbers = #tpu.dot_dimension_numbers<[2], [2], [1], [1], [0, 0, 0, 1, 1, 1], [0], [0]>} : vector<2x8x8xf32>, vector<2x8x8xf32>, vector<2x8x8xf32> -> vector<2x8x8xf32>
    %cst_22 = arith.constant 0.000000e+00 : f32
    "tpu.trace_stop"() : () -> ()
    %49 = vector.broadcast %cst_22 : f32 to vector<2x8x8xf32>
    %50 = arith.cmpf oeq, %20, %49 : vector<2x8x8xf32>
    %cst_23 = arith.constant -1.000000e+09 : f32
    %51 = vector.broadcast %cst_23 : f32 to vector<2x8x8xf32>
    %52 = arith.select %50, %51, %48 : vector<2x8x8xi1>, vector<2x8x8xf32>
    %cst_24 = arith.constant dense<0xFF800000> : vector<2x8xf32>
    %53 = vector.multi_reduction <maximumf>, %52, %cst_24 [2] : vector<2x8x8xf32> to vector<2x8xf32>
    %54 = vector.shape_cast %53 : vector<2x8xf32> to vector<2x8x1xf32>
    %55 = vector.broadcast %54 : vector<2x8x1xf32> to vector<2x8x8xf32>
    %56 = arith.subf %52, %55 : vector<2x8x8xf32>
    %57 = math.exp %56 : vector<2x8x8xf32>
    %cst_25 = arith.constant dense<0.000000e+00> : vector<2x8xf32>
    %58 = vector.multi_reduction <add>, %57, %cst_25 [2] : vector<2x8x8xf32> to vector<2x8xf32>
    %59 = vector.shape_cast %58 : vector<2x8xf32> to vector<2x8x1xf32>
    %60 = tpu.reciprocal %59 {approx = true} : vector<2x8x1xf32> -> vector<2x8x1xf32>
    %61 = vector.broadcast %60 : vector<2x8x1xf32> to vector<2x8x8xf32>
    %62 = arith.mulf %57, %61 : vector<2x8x8xf32>
    "tpu.trace_start"() <{level = 10 : i32, message = "bqk,bkd->bqd"}> : () -> ()
    %cst_26 = arith.constant dense<0.000000e+00> : vector<2x8x8xf32>
    %63 = tpu.matmul %62, %47, %cst_26 {dimension_numbers = #tpu.dot_dimension_numbers<[2], [1], [1], [2], [0, 0, 0, 1, 1, 2], [0], [0]>} : vector<2x8x8xf32>, vector<2x8x8xf32>, vector<2x8x8xf32> -> vector<2x8x8xf32>
    "tpu.trace_stop"() : () -> ()
    %64 = vector.shape_cast %63 : vector<2x8x8xf32> to vector<16x8xf32>
    %65 = arith.truncf %64 : vector<16x8xf32> to vector<16x8xbf16>
    %c1 = arith.constant 1 : index
    %c0_27 = arith.constant 0 : index
    %c0_28 = arith.constant 0 : index
    %66 = vector.load %arg4[%c1, %c0_27, %c0_28] : memref<4x8x32xbf16, #tpu.memory_space<vmem>>, vector<1x8x32xbf16>
    %67 = vector.shape_cast %66 : vector<1x8x32xbf16> to vector<8x32xbf16>
    %cst_29 = arith.constant dense<0.000000e+00> : vector<16x32xf32>
    %68 = tpu.matmul %65, %67, %cst_29 {dimension_numbers = #tpu.dot_dimension_numbers<[1], [0], [0], [1], [0, 0, 1, 1], [], []>} : vector<16x8xbf16>, vector<8x32xbf16>, vector<16x32xf32> -> vector<16x32xf32>
    %69 = arith.addf %44, %68 : vector<16x32xf32>
    %70 = vector.extract_strided_slice %15 {offsets = [0, 0, 16], sizes = [2, 8, 8], strides = [1, 1, 1]} : vector<2x8x32xf32> to vector<2x8x8xf32>
    %71 = vector.extract_strided_slice %17 {offsets = [0, 0, 16], sizes = [2, 8, 8], strides = [1, 1, 1]} : vector<2x8x32xf32> to vector<2x8x8xf32>
    %72 = vector.extract_strided_slice %19 {offsets = [0, 0, 16], sizes = [2, 8, 8], strides = [1, 1, 1]} : vector<2x8x32xf32> to vector<2x8x8xf32>
    "tpu.trace_start"() <{level = 10 : i32, message = "bqd,bkd->bqk"}> : () -> ()
    %cst_30 = arith.constant dense<0.000000e+00> : vector<2x8x8xf32>
    %73 = tpu.matmul %70, %71, %cst_30 {dimension_numbers = #tpu.dot_dimension_numbers<[2], [2], [1], [1], [0, 0, 0, 1, 1, 1], [0], [0]>} : vector<2x8x8xf32>, vector<2x8x8xf32>, vector<2x8x8xf32> -> vector<2x8x8xf32>
    %cst_31 = arith.constant 0.000000e+00 : f32
    "tpu.trace_stop"() : () -> ()
    %74 = vector.broadcast %cst_31 : f32 to vector<2x8x8xf32>
    %75 = arith.cmpf oeq, %20, %74 : vector<2x8x8xf32>
    %cst_32 = arith.constant -1.000000e+09 : f32
    %76 = vector.broadcast %cst_32 : f32 to vector<2x8x8xf32>
    %77 = arith.select %75, %76, %73 : vector<2x8x8xi1>, vector<2x8x8xf32>
    %cst_33 = arith.constant dense<0xFF800000> : vector<2x8xf32>
    %78 = vector.multi_reduction <maximumf>, %77, %cst_33 [2] : vector<2x8x8xf32> to vector<2x8xf32>
    %79 = vector.shape_cast %78 : vector<2x8xf32> to vector<2x8x1xf32>
    %80 = vector.broadcast %79 : vector<2x8x1xf32> to vector<2x8x8xf32>
    %81 = arith.subf %77, %80 : vector<2x8x8xf32>
    %82 = math.exp %81 : vector<2x8x8xf32>
    %cst_34 = arith.constant dense<0.000000e+00> : vector<2x8xf32>
    %83 = vector.multi_reduction <add>, %82, %cst_34 [2] : vector<2x8x8xf32> to vector<2x8xf32>
    %84 = vector.shape_cast %83 : vector<2x8xf32> to vector<2x8x1xf32>
    %85 = tpu.reciprocal %84 {approx = true} : vector<2x8x1xf32> -> vector<2x8x1xf32>
    %86 = vector.broadcast %85 : vector<2x8x1xf32> to vector<2x8x8xf32>
    %87 = arith.mulf %82, %86 : vector<2x8x8xf32>
    "tpu.trace_start"() <{level = 10 : i32, message = "bqk,bkd->bqd"}> : () -> ()
    %cst_35 = arith.constant dense<0.000000e+00> : vector<2x8x8xf32>
    %88 = tpu.matmul %87, %72, %cst_35 {dimension_numbers = #tpu.dot_dimension_numbers<[2], [1], [1], [2], [0, 0, 0, 1, 1, 2], [0], [0]>} : vector<2x8x8xf32>, vector<2x8x8xf32>, vector<2x8x8xf32> -> vector<2x8x8xf32>
    "tpu.trace_stop"() : () -> ()
    %89 = vector.shape_cast %88 : vector<2x8x8xf32> to vector<16x8xf32>
    %90 = arith.truncf %89 : vector<16x8xf32> to vector<16x8xbf16>
    %c2 = arith.constant 2 : index
    %c0_36 = arith.constant 0 : index
    %c0_37 = arith.constant 0 : index
    %91 = vector.load %arg4[%c2, %c0_36, %c0_37] : memref<4x8x32xbf16, #tpu.memory_space<vmem>>, vector<1x8x32xbf16>
    %92 = vector.shape_cast %91 : vector<1x8x32xbf16> to vector<8x32xbf16>
    %cst_38 = arith.constant dense<0.000000e+00> : vector<16x32xf32>
    %93 = tpu.matmul %90, %92, %cst_38 {dimension_numbers = #tpu.dot_dimension_numbers<[1], [0], [0], [1], [0, 0, 1, 1], [], []>} : vector<16x8xbf16>, vector<8x32xbf16>, vector<16x32xf32> -> vector<16x32xf32>
    %94 = arith.addf %69, %93 : vector<16x32xf32>
    %95 = vector.extract_strided_slice %15 {offsets = [0, 0, 24], sizes = [2, 8, 8], strides = [1, 1, 1]} : vector<2x8x32xf32> to vector<2x8x8xf32>
    %96 = vector.extract_strided_slice %17 {offsets = [0, 0, 24], sizes = [2, 8, 8], strides = [1, 1, 1]} : vector<2x8x32xf32> to vector<2x8x8xf32>
    %97 = vector.extract_strided_slice %19 {offsets = [0, 0, 24], sizes = [2, 8, 8], strides = [1, 1, 1]} : vector<2x8x32xf32> to vector<2x8x8xf32>
    "tpu.trace_start"() <{level = 10 : i32, message = "bqd,bkd->bqk"}> : () -> ()
    %cst_39 = arith.constant dense<0.000000e+00> : vector<2x8x8xf32>
    %98 = tpu.matmul %95, %96, %cst_39 {dimension_numbers = #tpu.dot_dimension_numbers<[2], [2], [1], [1], [0, 0, 0, 1, 1, 1], [0], [0]>} : vector<2x8x8xf32>, vector<2x8x8xf32>, vector<2x8x8xf32> -> vector<2x8x8xf32>
    %cst_40 = arith.constant 0.000000e+00 : f32
    "tpu.trace_stop"() : () -> ()
    %99 = vector.broadcast %cst_40 : f32 to vector<2x8x8xf32>
    %100 = arith.cmpf oeq, %20, %99 : vector<2x8x8xf32>
    %cst_41 = arith.constant -1.000000e+09 : f32
    %101 = vector.broadcast %cst_41 : f32 to vector<2x8x8xf32>
    %102 = arith.select %100, %101, %98 : vector<2x8x8xi1>, vector<2x8x8xf32>
    %cst_42 = arith.constant dense<0xFF800000> : vector<2x8xf32>
    %103 = vector.multi_reduction <maximumf>, %102, %cst_42 [2] : vector<2x8x8xf32> to vector<2x8xf32>
    %104 = vector.shape_cast %103 : vector<2x8xf32> to vector<2x8x1xf32>
    %105 = vector.broadcast %104 : vector<2x8x1xf32> to vector<2x8x8xf32>
    %106 = arith.subf %102, %105 : vector<2x8x8xf32>
    %107 = math.exp %106 : vector<2x8x8xf32>
    %cst_43 = arith.constant dense<0.000000e+00> : vector<2x8xf32>
    %108 = vector.multi_reduction <add>, %107, %cst_43 [2] : vector<2x8x8xf32> to vector<2x8xf32>
    %109 = vector.shape_cast %108 : vector<2x8xf32> to vector<2x8x1xf32>
    %110 = tpu.reciprocal %109 {approx = true} : vector<2x8x1xf32> -> vector<2x8x1xf32>
    %111 = vector.broadcast %110 : vector<2x8x1xf32> to vector<2x8x8xf32>
    %112 = arith.mulf %107, %111 : vector<2x8x8xf32>
    "tpu.trace_start"() <{level = 10 : i32, message = "bqk,bkd->bqd"}> : () -> ()
    %cst_44 = arith.constant dense<0.000000e+00> : vector<2x8x8xf32>
    %113 = tpu.matmul %112, %97, %cst_44 {dimension_numbers = #tpu.dot_dimension_numbers<[2], [1], [1], [2], [0, 0, 0, 1, 1, 2], [0], [0]>} : vector<2x8x8xf32>, vector<2x8x8xf32>, vector<2x8x8xf32> -> vector<2x8x8xf32>
    "tpu.trace_stop"() : () -> ()
    %114 = vector.shape_cast %113 : vector<2x8x8xf32> to vector<16x8xf32>
    %115 = arith.truncf %114 : vector<16x8xf32> to vector<16x8xbf16>
    %c3 = arith.constant 3 : index
    %c0_45 = arith.constant 0 : index
    %c0_46 = arith.constant 0 : index
    %116 = vector.load %arg4[%c3, %c0_45, %c0_46] : memref<4x8x32xbf16, #tpu.memory_space<vmem>>, vector<1x8x32xbf16>
    %117 = vector.shape_cast %116 : vector<1x8x32xbf16> to vector<8x32xbf16>
    %cst_47 = arith.constant dense<0.000000e+00> : vector<16x32xf32>
    %118 = tpu.matmul %115, %117, %cst_47 {dimension_numbers = #tpu.dot_dimension_numbers<[1], [0], [0], [1], [0, 0, 1, 1], [], []>} : vector<16x8xbf16>, vector<8x32xbf16>, vector<16x32xf32> -> vector<16x32xf32>
    %119 = arith.addf %94, %118 : vector<16x32xf32>
    %120 = vector.broadcast %3 : vector<1x32xf32> to vector<16x32xf32>
    %121 = arith.addf %119, %120 : vector<16x32xf32>
    %122 = arith.addf %121, %0 : vector<16x32xf32>
    %cst_48 = arith.constant dense<0.000000e+00> : vector<16xf32>
    %123 = vector.multi_reduction <add>, %122, %cst_48 [1] : vector<16x32xf32> to vector<16xf32>
    %124 = vector.shape_cast %123 : vector<16xf32> to vector<16x1xf32>
    %cst_49 = arith.constant 3.200000e+01 : f32
    %125 = vector.broadcast %cst_49 : f32 to vector<16x1xf32>
    %126 = arith.divf %124, %125 : vector<16x1xf32>
    %127 = vector.broadcast %126 : vector<16x1xf32> to vector<16x32xf32>
    %128 = arith.subf %122, %127 : vector<16x32xf32>
    %129 = arith.mulf %128, %128 : vector<16x32xf32>
    %cst_50 = arith.constant dense<0.000000e+00> : vector<16xf32>
    %130 = vector.multi_reduction <add>, %129, %cst_50 [1] : vector<16x32xf32> to vector<16xf32>
    %131 = vector.shape_cast %130 : vector<16xf32> to vector<16x1xf32>
    %cst_51 = arith.constant 3.200000e+01 : f32
    %132 = vector.broadcast %cst_51 : f32 to vector<16x1xf32>
    %133 = arith.divf %131, %132 : vector<16x1xf32>
    %134 = vector.broadcast %126 : vector<16x1xf32> to vector<16x32xf32>
    %135 = arith.subf %122, %134 : vector<16x32xf32>
    %cst_52 = arith.constant 9.99999974E-6 : f32
    %136 = vector.broadcast %cst_52 : f32 to vector<16x1xf32>
    %137 = arith.addf %133, %136 : vector<16x1xf32>
    %138 = math.rsqrt %137 : vector<16x1xf32>
    %139 = vector.broadcast %138 : vector<16x1xf32> to vector<16x32xf32>
    %140 = arith.mulf %135, %139 : vector<16x32xf32>
    %141 = vector.broadcast %4 : vector<1x32xf32> to vector<16x32xf32>
    %142 = arith.mulf %140, %141 : vector<16x32xf32>
    %143 = vector.broadcast %5 : vector<1x32xf32> to vector<16x32xf32>
    %144 = arith.addf %142, %143 : vector<16x32xf32>
    %145 = arith.truncf %144 : vector<16x32xf32> to vector<16x32xbf16>
    %c0_53 = arith.constant 0 : index
    %c0_54 = arith.constant 0 : index
    %146 = vector.load %arg6[%c0_53, %c0_54] : memref<32x2048xbf16, #tpu.memory_space<vmem>>, vector<32x2048xbf16>
    %cst_55 = arith.constant dense<0.000000e+00> : vector<16x2048xf32>
    %147 = tpu.matmul %145, %146, %cst_55 {dimension_numbers = #tpu.dot_dimension_numbers<[1], [0], [0], [1], [0, 0, 1, 1], [], []>} : vector<16x32xbf16>, vector<32x2048xbf16>, vector<16x2048xf32> -> vector<16x2048xf32>
    %c0_56 = arith.constant 0 : index
    %c0_57 = arith.constant 0 : index
    %148 = vector.load %arg7[%c0_56, %c0_57] : memref<1x2048xf32, #tpu.memory_space<vmem>>, vector<1x2048xf32>
    %149 = vector.broadcast %148 : vector<1x2048xf32> to vector<16x2048xf32>
    %150 = arith.addf %147, %149 : vector<16x2048xf32>
    %cst_58 = arith.constant 0.000000e+00 : f32
    %151 = vector.broadcast %cst_58 : f32 to vector<16x2048xf32>
    %152 = arith.maximumf %150, %151 : vector<16x2048xf32>
    %153 = arith.truncf %152 : vector<16x2048xf32> to vector<16x2048xbf16>
    %c0_59 = arith.constant 0 : index
    %c0_60 = arith.constant 0 : index
    %154 = vector.load %arg8[%c0_59, %c0_60] : memref<32x2048xbf16, #tpu.memory_space<vmem>>, vector<32x2048xbf16>
    %cst_61 = arith.constant dense<0.000000e+00> : vector<16x32xf32>
    %155 = tpu.matmul %153, %154, %cst_61 {dimension_numbers = #tpu.dot_dimension_numbers<[1], [1], [0], [0], [0, 0, 1, 0], [], []>} : vector<16x2048xbf16>, vector<32x2048xbf16>, vector<16x32xf32> -> vector<16x32xf32>
    %156 = vector.broadcast %6 : vector<1x32xf32> to vector<16x32xf32>
    %157 = arith.addf %155, %156 : vector<16x32xf32>
    %158 = arith.addf %157, %144 : vector<16x32xf32>
    %cst_62 = arith.constant dense<0.000000e+00> : vector<16xf32>
    %159 = vector.multi_reduction <add>, %158, %cst_62 [1] : vector<16x32xf32> to vector<16xf32>
    %160 = vector.shape_cast %159 : vector<16xf32> to vector<16x1xf32>
    %cst_63 = arith.constant 3.200000e+01 : f32
    %161 = vector.broadcast %cst_63 : f32 to vector<16x1xf32>
    %162 = arith.divf %160, %161 : vector<16x1xf32>
    %163 = vector.broadcast %162 : vector<16x1xf32> to vector<16x32xf32>
    %164 = arith.subf %158, %163 : vector<16x32xf32>
    %165 = arith.mulf %164, %164 : vector<16x32xf32>
    %cst_64 = arith.constant dense<0.000000e+00> : vector<16xf32>
    %166 = vector.multi_reduction <add>, %165, %cst_64 [1] : vector<16x32xf32> to vector<16xf32>
    %167 = vector.shape_cast %166 : vector<16xf32> to vector<16x1xf32>
    %cst_65 = arith.constant 3.200000e+01 : f32
    %168 = vector.broadcast %cst_65 : f32 to vector<16x1xf32>
    %169 = arith.divf %167, %168 : vector<16x1xf32>
    %170 = vector.broadcast %162 : vector<16x1xf32> to vector<16x32xf32>
    %171 = arith.subf %158, %170 : vector<16x32xf32>
    %cst_66 = arith.constant 9.99999974E-6 : f32
    %172 = vector.broadcast %cst_66 : f32 to vector<16x1xf32>
    %173 = arith.addf %169, %172 : vector<16x1xf32>
    %174 = math.rsqrt %173 : vector<16x1xf32>
    %175 = vector.broadcast %174 : vector<16x1xf32> to vector<16x32xf32>
    %176 = arith.mulf %171, %175 : vector<16x32xf32>
    %177 = vector.broadcast %4 : vector<1x32xf32> to vector<16x32xf32>
    %178 = arith.mulf %176, %177 : vector<16x32xf32>
    %179 = vector.broadcast %5 : vector<1x32xf32> to vector<16x32xf32>
    %180 = arith.addf %178, %179 : vector<16x32xf32>
    %c0_67 = arith.constant 0 : index
    %c0_68 = arith.constant 0 : index
    %181 = vector.load %arg9[%c0_67, %c0_68] : memref<16x32xf32, #tpu.memory_space<vmem>>, vector<16x32xf32>
    tpu.vector_store %arg9[%c0_67, %c0_68], %180 {strides = array<i32>} : memref<16x32xf32, #tpu.memory_space<vmem>>, vector<16x32xf32>,
    return
  }
}

</mosaic_0001>

<bundles_post_ra>
// kernel: tpu_custom_call.1
= control target key start
LH: loop header
LB: loop body
LE: loop exit
PB: predicated region body
PF: predicated region fallthrough
CT: control target
= control target key end

     0   :  { %14 = vsyncpa [#allocation3], 0  ;;  %s4086_s0 = inlined_call_operand.hbm [shape: f32[16,32], index: 0, kind: input, shape index: {}]   ;;  %s4087_s1 = inlined_call_operand.hbm [shape: f32[2,8,8], index: 1, kind: input, shape index: {}]   ;;  %s4088_s2 = inlined_call_operand.hbm [shape: bf16[32,96], index: 2, kind: input, shape index: {}]   ;;  %s4089_s3 = inlined_call_operand.vmem [shape: f32[1,96], index: 3, kind: input, shape index: {}]   ;;  %s4090_s4 = inlined_call_operand.hbm [shape: bf16[4,8,32], index: 4, kind: input, shape index: {}]   ;;  %s4091_s5 = inlined_call_operand.vmem [shape: f32[4,32], index: 5, kind: input, shape index: {}]   ;;  %s4092_s6 = inlined_call_operand.hbm [shape: bf16[32,2048], index: 6, kind: input, shape index: {}]   ;;  %s4093_s7 = inlined_call_operand.vmem [shape: f32[1,2048], index: 7, kind: input, shape index: {}]   ;;  %s4094_s8 = inlined_call_operand.hbm [shape: bf16[32,2048], index: 8, kind: input, shape index: {}]   ;;  %s4095_s9 = inlined_call_operand.hbm [shape: f32[16,32], index: 9, kind: output, shape index: {}]  }
   0x1   :  { %15 = vsyncpa [#allocation6], 0 }
   0x2   :  { %16 = vsyncpa [#allocation9], 0 }
   0x3   :  { %17 = vsyncpa [#allocation12], 0 }
   0x4   :  { %18 = vsyncpa [#allocation4], 0  ;;  %s3514_s30 = smov [#allocation5]   ;;  %s3350_s13 = scalar_lea.hbm %s4087_s1, 256 }
   0x5   :  { %s36_s10 = sshll.u32 %s3514_s30, 4  ;;  %p3351_p0 = scmp.ne.s32.totalorder %s4087_s1, %s3350_s13  ;;  %s37_s10 = int_to_ptr.vmem [resolvable:$true] %s36_s10 }
   0x6   :  { %p3354_p1 = scmp.lt.u32.totalorder %s3350_s13, %s4087_s1 }
   0x8   :  { %p3356_p2 = pnand %p3354_p1, %p3351_p0 }
   0xa   :  { %3359 = shalt.err (!%p3356_p2)
}
   0xb   :  { %s3360_s18 = scalar_lea.vmem %s37_s10, 256  ;;  %p3365_p4 = scmp.lt.s32.totalorder %s37_s10, %s37_s10 }
   0xc   :  { %p3361_p3 = scmp.ne.s32.totalorder %s37_s10, %s3360_s18  ;;  %p3366_p5 = scmp.lt.s32.totalorder %s3360_s18, %s3360_s18 }
   0xe   :  { %p3367_p6 = por %p3366_p5, %p3365_p4 }
  0x10   :  { %p3368_p7 = pnand %p3367_p6, %p3361_p3 }
  0x12   :  { %3371 = shalt.err (!%p3368_p7)
}
  0x13   :  { %s3515_s19 = smov 128   ;;  %s3516_s20 = smov 8  }
  0x14   :  { %42 = dma.hbm_to_vmem [thread:$0]  %s4087_s1, 256, %s37_s10, [#allocation6], %s3515_s19, %s3515_s19, %s3516_s20  }
  0x15   :  { %s3517_s23 = smov [#allocation8]   ;;  %s3518_s25 = smov [#allocation2]  }
  0x16   :  { %s62_s24 = sshll.u32 %s3517_s23, 4  ;;  %s24_s26 = sshll.u32 %s3518_s25, 4  ;;  %s63_s24 = int_to_ptr.vmem [resolvable:$true] %s62_s24  ;;  %s25_s26 = int_to_ptr.vmem [resolvable:$true] %s24_s26 }
  0x17   :  { %s3372_s29 = scalar_lea.hbm %s4090_s4, 256 }
  0x18   :  { %p3373_p8 = scmp.ne.s32.totalorder %s4090_s4, %s3372_s29  ;;  %p3376_p9 = scmp.lt.u32.totalorder %s3372_s29, %s4090_s4 }
  0x1a   :  { %p3378_p10 = pnand %p3376_p9, %p3373_p8 }
  0x1c   :  { %3381 = shalt.err (!%p3378_p10)
}
  0x1d   :  { %s3382_s1 = scalar_lea.vmem %s63_s24, 256  ;;  %p3387_p12 = scmp.lt.s32.totalorder %s63_s24, %s63_s24 }
  0x1e   :  { %p3383_p11 = scmp.ne.s32.totalorder %s63_s24, %s3382_s1  ;;  %p3388_p13 = scmp.lt.s32.totalorder %s3382_s1, %s3382_s1 }
  0x20   :  { %p3389_p0 = por %p3388_p13, %p3387_p12 }
  0x22   :  { %p3390_p1 = pnand %p3389_p0, %p3383_p11 }
  0x24   :  { %3393 = shalt.err (!%p3390_p1)
}
  0x25   :  { %s3519_s10 = smov 64   ;;  %s3520_s14 = smov 4  }
  0x26   :  { %68 = dma.hbm_to_vmem [thread:$0]  %s4090_s4, 256, %s63_s24, [#allocation9], %s3519_s10, %s3519_s10, %s3520_s14  }
  0x27   :  { %s3394_s21 = scalar_lea.hbm %s4086_s0, 256 }
  0x28   :  { %p3395_p2 = scmp.ne.s32.totalorder %s4086_s0, %s3394_s21  ;;  %p3398_p3 = scmp.lt.u32.totalorder %s3394_s21, %s4086_s0 }
  0x2a   :  { %p3400_p4 = pnand %p3398_p3, %p3395_p2 }
  0x2c   :  { %3403 = shalt.err (!%p3400_p4)
}
  0x2d   :  { %s3404_s28 = scalar_lea.vmem %s25_s26, 256  ;;  %p3409_p6 = scmp.lt.s32.totalorder %s25_s26, %s25_s26 }
  0x2e   :  { %p3405_p5 = scmp.ne.s32.totalorder %s25_s26, %s3404_s28  ;;  %p3410_p7 = scmp.lt.s32.totalorder %s3404_s28, %s3404_s28 }
  0x30   :  { %p3411_p8 = por %p3410_p7, %p3409_p6 }
  0x32   :  { %p3412_p9 = pnand %p3411_p8, %p3405_p5 }
  0x34   :  { %3415 = shalt.err (!%p3412_p9)
}
  0x35   :  { %30 = dma.hbm_to_vmem [thread:$0]  %s4086_s0, 256, %s25_s26, [#allocation3], %s3515_s19, %s3515_s19, %s3516_s20  }
  0x36   :  { %s3521_s29 = smov [#allocation7]   ;;  %s3522_s11 = smov [#allocation10]  }
  0x37   :  { %s48_s30 = sshll.u32 %s3521_s29, 4  ;;  %s76_s12 = sshll.u32 %s3522_s11, 4  ;;  %s49_s30 = int_to_ptr.vmem [resolvable:$true] %s48_s30  ;;  %s77_s12 = int_to_ptr.vmem [resolvable:$true] %s76_s12 }
  0x38   :  { %s3416_s15 = scalar_lea.hbm %s4088_s2, 256 }
  0x39   :  { %p3417_p10 = scmp.ne.s32.totalorder %s4088_s2, %s3416_s15  ;;  %p3420_p11 = scmp.lt.u32.totalorder %s3416_s15, %s4088_s2 }
  0x3b   :  { %p3422_p12 = pnand %p3420_p11, %p3417_p10 }
  0x3d   :  { %3425 = shalt.err (!%p3422_p12)
}
  0x3e   :  { %s3426_s0 = scalar_lea.vmem %s49_s30, 256  ;;  %p3431_p0 = scmp.lt.s32.totalorder %s49_s30, %s49_s30 }
  0x3f   :  { %p3427_p13 = scmp.ne.s32.totalorder %s49_s30, %s3426_s0  ;;  %p3432_p1 = scmp.lt.s32.totalorder %s3426_s0, %s3426_s0 }
  0x41   :  { %p3433_p2 = por %p3432_p1, %p3431_p0 }
  0x43   :  { %p3434_p3 = pnand %p3433_p2, %p3427_p13 }
  0x45   :  { %3437 = shalt.err (!%p3434_p3)
}
  0x46   :  { %54 = dma.hbm_to_vmem [thread:$0]  %s4088_s2, 256, %s49_s30, [#allocation6], %s3519_s10, %s3519_s10, %s3520_s14  }
  0x47   :  { %s3438_s27 = scalar_lea.hbm %s4092_s6, 4096 }
  0x48   :  { %p3439_p4 = scmp.ne.s32.totalorder %s4092_s6, %s3438_s27  ;;  %p3442_p5 = scmp.lt.u32.totalorder %s3438_s27, %s4092_s6 }
  0x4a   :  { %p3444_p6 = pnand %p3442_p5, %p3439_p4 }
  0x4c   :  { %3447 = shalt.err (!%p3444_p6)
}
  0x4d   :  { %s3448_s11 = scalar_lea.vmem %s77_s12, 4096  ;;  %p3453_p8 = scmp.lt.s32.totalorder %s77_s12, %s77_s12 }
  0x4e   :  { %p3449_p7 = scmp.ne.s32.totalorder %s77_s12, %s3448_s11  ;;  %p3454_p9 = scmp.lt.s32.totalorder %s3448_s11, %s3448_s11 }
  0x50   :  { %p3455_p10 = por %p3454_p9, %p3453_p8 }
  0x52   :  { %p3456_p11 = pnand %p3455_p10, %p3449_p7 }
  0x54   :  { %3459 = shalt.err (!%p3456_p11)
}
  0x55   :  { %s3523_s2 = smov 1024   ;;  %s3524_s13 = smov [#allocation11]  }
  0x56   :  { %82 = dma.hbm_to_vmem [thread:$0]  %s4092_s6, 4096, %s77_s12, [#allocation9], %s3523_s2, %s3523_s2, %s3519_s10  }
  0x57   :  { %s90_s1 = sshll.u32 %s3524_s13, 4  ;;  %s3460_s17 = scalar_lea.hbm %s4094_s8, 4096  ;;  %s91_s1 = int_to_ptr.vmem [resolvable:$true] %s90_s1 }
  0x58   :  { %p3461_p12 = scmp.ne.s32.totalorder %s4094_s8, %s3460_s17  ;;  %p3464_p13 = scmp.lt.u32.totalorder %s3460_s17, %s4094_s8 }
  0x5a   :  { %p3466_p0 = pnand %p3464_p13, %p3461_p12 }
  0x5c   :  { %3469 = shalt.err (!%p3466_p0)
}
  0x5d   :  { %s3470_s22 = scalar_lea.vmem %s91_s1, 4096  ;;  %p3475_p2 = scmp.lt.s32.totalorder %s91_s1, %s91_s1 }
  0x5e   :  { %p3471_p1 = scmp.ne.s32.totalorder %s91_s1, %s3470_s22  ;;  %p3476_p3 = scmp.lt.s32.totalorder %s3470_s22, %s3470_s22 }
  0x60   :  { %p3477_p4 = por %p3476_p3, %p3475_p2 }
  0x62   :  { %p3478_p5 = pnand %p3477_p4, %p3471_p1 }
  0x64   :  { %3481 = shalt.err (!%p3478_p5)
}
  0x65   :  { %96 = dma.hbm_to_vmem [thread:$0]  %s4094_s8, 4096, %s91_s1, [#allocation12], %s3523_s2, %s3523_s2, %s3519_s10  }
  0x66   :  { %3504 = dma.done.wait [#allocation3], 256  }
  0x67   :  { %3505 = vsyncadd [#allocation3], 4294967040 }
  0x68   :  { %3506 = dma.done.wait [#allocation6], 512  }
  0x69   :  { %3507 = vsyncadd [#allocation6], 4294966784 }
  0x6a   :  { %3508 = dma.done.wait [#allocation9], 4352  }
  0x6b   :  { %3509 = vsyncadd [#allocation9], 4294962944 }
  0x6c   :  { %3510 = dma.done.wait [#allocation12], 4096  }
  0x6d   :  { %3511 = vsyncadd [#allocation12], 4294963200  ;;  %v3525_v0 = vmov 0.0   ;;  %vm3526_vm0 = vmmov 0   ;;  %v3308_v1 = vld [vmem:[#allocation7] sm:$0xff]   ;;  %v3309_v2 = vld [vmem:[#allocation7 + $0x8] sm:$0xff]  }
  0x6e   :  { %3171 = vmatprep.subr.bf16.mxu0 %v3525_v0  ;;  %3175 = vmatprep.mubr.msk.bf16.mxu0 %vm3526_vm0, %v3525_v0  ;;  %v3681_v3 = vld [vmem:[#allocation2] sm:$0xff]  ;;  %v3683_v4 = vld [vmem:[#allocation2 + $0x8] sm:$0xff]  ;;  %vm143_vm1 = vcmask 261120   ;;  %s3527_s25 = smov 96   ;;  %vm195_vm2 = vcmask 64512   ;;  %v3719_v17 = vld [vmem:[#allocation5] sm:$0xff] }
  0x6f   :  { %3179 = vmatprep.subr.mxu1 %v3525_v0  ;;  %3181 = vmatprep.mubr.msk.f32.mxu1 %vm3526_vm0, %v3525_v0  ;;  %v118_v5 = vpack.c.bf16 %v3683_v4, %v3681_v3  ;;  %v3024_v6 = vld [vmem:[%s4089_s3] ss:$0 sm:$0xff]  ;;  %vm349_vm3 = vcmp.eq.f32.partialorder %v3719_v17, 0.0  ;;  %v3722_v18 = vld [vmem:[#allocation5 + $0x8] sm:$0xff]  ;;  %s3528_s3 = smov 88   ;;  %s3530_s27 = smov 56  }
  0x70   :  { %3172 = vmatpush3.bf16.msra.mxu0 %v3308_v1  ;;  %vm350_vm4 = vcmp.eq.f32.partialorder %v3722_v18, 0.0  ;;  %s3531_s28 = smov 80   ;;  %s3532_s4 = smov 112   ;;  %vm867_vm5 = vcmask 1043456  }
  0x71   :  { %3173 = vmatprep.subr.bf16.mxu0 %v3525_v0  ;;  %s3533_s24 = smov 72   ;;  %s3534_s29 = smov 48  }
  0x72   :  { %s3535_s11 = smov 104   ;;  %s3536_s2 = smov 40  }
  0x74   :  { %3174 = vmatpush3.bf16.msra.mxu0 %v3309_v2 }
  0x75   :  { %3194 = vmatprep.subr.mxu0 %v3525_v0 }
  0x77   :  { %3176 = vmatmul.mubr.msk.bf16.vlgmr.msra.gmra.mrb[0].mxu0 %vm143_vm1, %v118_v5 }
  0x78   :  { %3196 = vmatprep.mubr.msk.f32.mxu0 %vm3526_vm0, %v3525_v0 }
 0x14a   :  { %v181_v7 = vpop.f32.mrb[0].mxu0 }
 0x14b   :  { %v3695_v8 = vadd.f32 %v3024_v6, %v181_v7  ;;  %v3177_v9 = vpop.f32.mrb[1].mxu0 }
 0x14c   :  { %v184_v10 = vpop.f32.mrb[2].mxu0 }
 0x14d   :  { %193 = vrot.lane.b32.xlu0 %v3695_v8, %s3527_s25  ;;  %v3178_v11 = vpop.f32.mrb[3].mxu0  ;;  %v3698_v12 = vadd.f32 %v3024_v6, %v184_v10  ;;  %v3703_v14 = vmul.f32 0.35355338, %v3695_v8 }
 0x14f   :  { %v3712_v16 = vmul.f32 0.35355338, %v3698_v12 }
 0x151   :  { %272 = vrot.lane.b32.xlu0 %v3698_v12, %s3527_s25 }
 0x1bf   :  { %v194_v13 = vpop.permute.xlu0 %193 }
 0x1c0   :  { %3180 = vmatpush3.xpose.msk.msra.mxu1 %vm195_vm2, %v194_v13 }
 0x1c1   :  { %3184 = vmatprep.subr.mxu1 %v3525_v0 }
 0x1c3   :  { %3182 = vmatmul.mubr.msk.f32.vlgmr.msra.gmra.mrb[0].mxu1 %vm195_vm2, %v3703_v14  ;;  %v273_v15 = vpop.permute.xlu0 %272 }
 0x1c4   :  { %3185 = vmatpush3.xpose.msk.msra.mxu1 %vm195_vm2, %v273_v15  ;;  %3186 = vmatprep.mubr.msk.f32.mxu1 %vm3526_vm0, %v3525_v0 }
 0x1c5   :  { %3189 = vmatprep.subr.mxu1 %v3525_v0 }
 0x1c7   :  { %3187 = vmatmul.mubr.msk.f32.vlgmr.msra.gmra.mrb[2].mxu1 %vm195_vm2, %v3712_v16 }
 0x1c8   :  { %3191 = vmatprep.mubr.msk.f32.mxu1 %vm3526_vm0, %v3525_v0 }
 0x296   :  { %v267_v19 = vpop.f32.mrb[0].mxu1 }
 0x297   :  { %v351_v20 = vsel %vm349_vm3, -1e+09, %v267_v19  ;;  %v3183_v21 = vpop.f32.mrb[1].mxu1 }
 0x298   :  { %v353_v22 = vsel %vm195_vm2, %v351_v20, -inf  ;;  %v863_v21 = vld [vmem:[#allocation8 + $0x4] sm:$0xf] }
 0x299   :  { %354 = vmax.xlane.f32.xlu1 %v353_v22 }
 0x29a   :  { %v345_v23 = vpop.f32.mrb[2].mxu1 }
 0x29b   :  { %v352_v24 = vsel %vm350_vm4, -1e+09, %v345_v23  ;;  %v3188_v25 = vpop.f32.mrb[3].mxu1 }
 0x29c   :  { %v356_v26 = vsel %vm195_vm2, %v352_v24, -inf  ;;  %v528_v25 = vld [vmem:[#allocation8] sm:$0xf] }
 0x29d   :  { %357 = vmax.xlane.f32.xlu1 %v356_v26 }
 0x2ae   :  { %375 = vrot.lane.b32.xlu1 %v3695_v8, %s3519_s10 }
 0x2b2   :  { %451 = vrot.lane.b32.xlu1 %v3698_v12, %s3519_s10  ;;  %s3529_s10 = smov 120  }
 0x2b6   :  { %531 = vrot.lane.b32.xlu1 %v3695_v8, %s3528_s3 }
 0x2ba   :  { %609 = vrot.lane.b32.xlu1 %v3698_v12, %s3528_s3 }
 0x326   :  { %v355_v27 = vpop.xlane.xlu1 %354 }
 0x327   :  { %v359_v28 = vsub.f32 %v351_v20, %v355_v27 }
 0x329   :  { %v361_v29 = vmul.f32 1.442695, %v359_v28  ;;  %v916_v28 = vsel %vm867_vm5, %v528_v25, 0 }
 0x32a   :  { %v358_v30 = vpop.xlane.xlu1 %357 }
 0x32b   :  { %3310 = vpow2.f32 %v361_v29  ;;  %v360_v31 = vsub.f32 %v352_v24, %v358_v30  ;;  %v869_v24 = vsel %vm867_vm5, %v863_v21, 0 }
 0x32d   :  { %v363_v32 = vmul.f32 1.442695, %v360_v31 }
 0x32e   :  { %v376_v33 = vpop.permute.xlu1 %375 }
 0x32f   :  { %3312 = vpow2.f32 %v363_v32  ;;  %3190 = vmatpush3.msra.mxu1 %v376_v33 }
 0x330   :  { %3199 = vmatprep.subr.mxu1 %v3525_v0 }
 0x332   :  { %v452_v34 = vpop.permute.xlu1 %451 }
 0x333   :  { %3195 = vmatpush3.msra.mxu0 %v452_v34 }
 0x334   :  { %3204 = vmatprep.subr.mxu0 %v3525_v0 }
 0x335   :  { %v3311_v35 = vpop.eup %3310 }
 0x336   :  { %v365_v36 = vsel %vm195_vm2, %v3311_v35, 0.0  ;;  %v532_v39 = vpop.permute.xlu1 %531 }
 0x337   :  { %366 = vadd.xlane.f32.xlu0 %v365_v36 }
 0x339   :  { %v3313_v37 = vpop.eup %3312 }
 0x33a   :  { %v368_v38 = vsel %vm195_vm2, %v3313_v37, 0.0  ;;  %v610_v40 = vpop.permute.xlu1 %609 }
 0x33b   :  { %369 = vadd.xlane.f32.xlu1 %v368_v38 }
 0x34c   :  { %607 = vrot.lane.b32.xlu1 %v3712_v16, %s3529_s10 }
 0x34d   :  { %529 = vrot.lane.b32.xlu0 %v3703_v14, %s3529_s10 }
 0x3c4   :  { %v367_v41 = vpop.xlane.xlu0 %366 }
 0x3c5   :  { %3314 = vrcp.f32 %v367_v41 }
 0x3c8   :  { %v370_v42 = vpop.xlane.xlu1 %369  ;;  %v530_v47 = vpop.permute.xlu0 %529 }
 0x3c9   :  { %3316 = vrcp.f32 %v370_v42 }
 0x3cc   :  { %v608_v48 = vpop.permute.xlu1 %607 }
 0x3cf   :  { %v3315_v43 = vpop.eup %3314 }
 0x3d0   :  { %v373_v44 = vmul.f32 %v3315_v43, %v3311_v35 }
 0x3d2   :  { %3192 = vmatmul.mubr.msk.f32.vlgmr.msra.gmra.mrb[4].mxu1 %vm195_vm2, %v373_v44 }
 0x3d3   :  { %v3317_v45 = vpop.eup %3316  ;;  %3200 = vmatpush3.xpose.msk.msra.mxu1 %vm195_vm2, %v532_v39  ;;  %3201 = vmatprep.mubr.msk.f32.mxu1 %vm3526_vm0, %v3525_v0 }
 0x3d4   :  { %v374_v46 = vmul.f32 %v3317_v45, %v3313_v37  ;;  %3209 = vmatprep.subr.mxu1 %v3525_v0 }
 0x3d6   :  { %3197 = vmatmul.mubr.msk.f32.vlgmr.msra.gmra.mrb[4].mxu0 %vm195_vm2, %v374_v46  ;;  %3202 = vmatmul.mubr.msk.f32.vlgmr.msra.gmra.mrb[6].mxu1 %vm195_vm2, %v530_v47 }
 0x3d7   :  { %3205 = vmatpush3.xpose.msk.msra.mxu0 %vm195_vm2, %v610_v40  ;;  %3206 = vmatprep.mubr.msk.f32.mxu0 %vm3526_vm0, %v3525_v0 }
 0x3d8   :  { %3214 = vmatprep.subr.mxu0 %v3525_v0  ;;  %3211 = vmatprep.mubr.msk.f32.mxu1 %vm3526_vm0, %v3525_v0 }
 0x3da   :  { %3207 = vmatmul.mubr.msk.f32.vlgmr.msra.gmra.mrb[6].mxu0 %vm195_vm2, %v608_v48 }
 0x3db   :  { %3216 = vmatprep.mubr.msk.f32.mxu0 %vm3526_vm0, %v3525_v0 }
 0x4a5   :  { %v3759_v49 = vpop.f32.mrb[4].mxu1 }
 0x4a6   :  { %v3193_v50 = vpop.f32.mrb[5].mxu1 }
 0x4a9   :  { %v3761_v51 = vpop.f32.mrb[4].mxu0  ;;  %v603_v52 = vpop.f32.mrb[6].mxu1 }
 0x4aa   :  { %v527_v53 = vpack.c.bf16 %v3761_v51, %v3759_v49  ;;  %v685_v54 = vsel %vm349_vm3, -1e+09, %v603_v52  ;;  %v3198_v55 = vpop.f32.mrb[5].mxu0  ;;  %v3203_v56 = vpop.f32.mrb[7].mxu1 }
 0x4ab   :  { %v687_v57 = vsel %vm195_vm2, %v685_v54, -inf }
 0x4ac   :  { %688 = vmax.xlane.f32.xlu1 %v687_v57 }
 0x4ad   :  { %v681_v58 = vpop.f32.mrb[6].mxu0 }
 0x4ae   :  { %v686_v59 = vsel %vm350_vm4, -1e+09, %v681_v58  ;;  %v3208_v60 = vpop.f32.mrb[7].mxu0 }
 0x4af   :  { %v690_v61 = vsel %vm195_vm2, %v686_v59, -inf }
 0x4b0   :  { %691 = vmax.xlane.f32.xlu0 %v690_v61 }
 0x4c6   :  { %785 = vrot.lane.b32.xlu0 %v3698_v12, %s3530_s27 }
 0x4ca   :  { %961 = vrot.lane.b32.xlu0 %v3695_v8, %s3531_s28 }
 0x539   :  { %v689_v62 = vpop.xlane.xlu1 %688 }
 0x53a   :  { %v693_v63 = vsub.f32 %v685_v54, %v689_v62 }
 0x53c   :  { %v695_v1 = vmul.f32 1.442695, %v693_v63 }
 0x53d   :  { %v692_v2 = vpop.xlane.xlu0 %691 }
 0x53e   :  { %3318 = vpow2.f32 %v695_v1  ;;  %v694_v5 = vsub.f32 %v686_v59, %v692_v2 }
 0x540   :  { %v697_v6 = vmul.f32 1.442695, %v694_v5 }
 0x541   :  { %v786_v7 = vpop.permute.xlu0 %785 }
 0x542   :  { %3320 = vpow2.f32 %v697_v6  ;;  %3215 = vmatpush3.msra.mxu0 %v786_v7 }
 0x543   :  { %3225 = vmatprep.subr.bf16.mxu0 %v3525_v0 }
 0x545   :  { %v962_v36 = vpop.permute.xlu0 %961 }
 0x548   :  { %v3319_v9 = vpop.eup %3318 }
 0x549   :  { %v699_v10 = vsel %vm195_vm2, %v3319_v9, 0.0 }
 0x54a   :  { %700 = vadd.xlane.f32.xlu1 %v699_v10 }
 0x54c   :  { %v3321_v11 = vpop.eup %3320 }
 0x54d   :  { %v702_v13 = vsel %vm195_vm2, %v3321_v11, 0.0 }
 0x54e   :  { %703 = vadd.xlane.f32.xlu1 %v702_v13 }
 0x55f   :  { %709 = vrot.lane.b32.xlu1 %v3695_v8, %s3530_s27 }
 0x563   :  { %1039 = vrot.lane.b32.xlu1 %v3698_v12, %s3531_s28 }
 0x567   :  { %1037 = vrot.lane.b32.xlu1 %v3712_v16, %s3532_s4 }
 0x56b   :  { %959 = vrot.lane.b32.xlu1 %v3703_v14, %s3532_s4 }
 0x56f   :  { %1345 = vrot.lane.b32.xlu1 %v3695_v8, %s3533_s24 }
 0x5d7   :  { %v701_v15 = vpop.xlane.xlu1 %700 }
 0x5d8   :  { %3322 = vrcp.f32 %v701_v15 }
 0x5db   :  { %v704_v19 = vpop.xlane.xlu1 %703 }
 0x5dc   :  { %3324 = vrcp.f32 %v704_v19 }
 0x5df   :  { %v710_v20 = vpop.permute.xlu1 %709 }
 0x5e0   :  { %3210 = vmatpush3.msra.mxu1 %v710_v20 }
 0x5e1   :  { %3219 = vmatprep.subr.bf16.mxu1 %v3525_v0 }
 0x5e2   :  { %v3323_v22 = vpop.eup %3322 }
 0x5e3   :  { %v707_v23 = vmul.f32 %v3323_v22, %v3319_v9  ;;  %v1040_v29 = vpop.permute.xlu1 %1039 }
 0x5e5   :  { %3212 = vmatmul.mubr.msk.f32.vlgmr.msra.gmra.mrb[8].mxu1 %vm195_vm2, %v707_v23 }
 0x5e6   :  { %v3325_v26 = vpop.eup %3324  ;;  %3220 = vmatpush3.bf16.msra.mxu1 %v869_v24  ;;  %3221 = vmatprep.mubr.msk.bf16.mxu1 %vm3526_vm0, %v3525_v0 }
 0x5e7   :  { %v708_v27 = vmul.f32 %v3325_v26, %v3321_v11  ;;  %3231 = vmatprep.subr.mxu1 %v3525_v0  ;;  %v1038_v30 = vpop.permute.xlu1 %1037 }
 0x5e9   :  { %3217 = vmatmul.mubr.msk.f32.vlgmr.msra.gmra.mrb[8].mxu0 %vm195_vm2, %v708_v27 }
 0x5ea   :  { %3226 = vmatpush3.bf16.msra.mxu0 %v916_v28  ;;  %3227 = vmatprep.mubr.msk.bf16.mxu0 %vm3526_vm0, %v3525_v0 }
 0x5eb   :  { %3236 = vmatprep.subr.mxu0 %v3525_v0  ;;  %v960_v41 = vpop.permute.xlu1 %959 }
 0x5ed   :  { %3228 = vmatmul.mubr.msk.bf16.vlgmr.msra.gmra.mrb[12].mxu0 %vm195_vm2, %v527_v53 }
 0x5ee   :  { %3238 = vmatprep.mubr.msk.f32.mxu0 %vm3526_vm0, %v3525_v0 }
 0x5ef   :  { %v1346_v60 = vpop.permute.xlu1 %1345 }
 0x5f3   :  { %3237 = vmatpush3.xpose.msk.msra.mxu0 %vm195_vm2, %v1040_v29 }
 0x5f4   :  { %3246 = vmatprep.subr.mxu0 %v3525_v0 }
 0x5f6   :  { %3239 = vmatmul.mubr.msk.f32.vlgmr.msra.gmra.mrb[10].mxu0 %vm195_vm2, %v1038_v30 }
 0x5f7   :  { %3248 = vmatprep.mubr.msk.f32.mxu0 %vm3526_vm0, %v3525_v0 }
 0x6b8   :  { %v781_v31 = vpop.f32.mrb[8].mxu1 }
 0x6b9   :  { %v3213_v32 = vpop.f32.mrb[9].mxu1 }
 0x6bc   :  { %v857_v33 = vpop.f32.mrb[8].mxu0 }
 0x6bd   :  { %v861_v34 = vpack.c.bf16 %v857_v33, %v781_v31  ;;  %v3218_v35 = vpop.f32.mrb[9].mxu0  ;;  %v1293_v31 = vld [vmem:[#allocation8 + $0x8] sm:$0xf] }
 0x6be   :  { %v1298_v32 = vsel %vm867_vm5, %v1293_v31, 0  ;;  %v1776_v31 = vld [vmem:[#allocation10 + $0x8] sm:$0xff] }
 0x6bf   :  { %3222 = vmatmul.mubr.msk.bf16.vlgmr.msra.gmra.mrb[12].mxu1 %vm195_vm2, %v861_v34 }
 0x6c0   :  { %3232 = vmatpush3.xpose.msk.msra.mxu1 %vm195_vm2, %v962_v36  ;;  %v952_v37 = vpop.f32.mrb[12].mxu0  ;;  %3233 = vmatprep.mubr.msk.f32.mxu1 %vm3526_vm0, %v3525_v0 }
 0x6c1   :  { %v3229_v38 = vpop.f32.mrb[13].mxu0  ;;  %3241 = vmatprep.subr.mxu1 %v3525_v0 }
 0x6c2   :  { %v955_v39 = vpop.f32.mrb[14].mxu0 }
 0x6c3   :  { %v3230_v40 = vpop.f32.mrb[15].mxu0 }
 0x6c7   :  { %3234 = vmatmul.mubr.msk.f32.vlgmr.msra.gmra.mrb[10].mxu1 %vm195_vm2, %v960_v41 }
 0x6c8   :  { %3243 = vmatprep.mubr.msk.f32.mxu1 %vm3526_vm0, %v3525_v0 }
 0x6c9   :  { %v1111_v42 = vpop.f32.mrb[10].mxu0 }
 0x6ca   :  { %v1116_v43 = vsel %vm350_vm4, -1e+09, %v1111_v42  ;;  %v3240_v44 = vpop.f32.mrb[11].mxu0 }
 0x6cb   :  { %v1120_v45 = vsel %vm195_vm2, %v1116_v43, -inf }
 0x6cc   :  { %1121 = vmax.xlane.f32.xlu0 %v1120_v45 }
 0x6e2   :  { %1215 = vrot.lane.b32.xlu0 %v3698_v12, %s3534_s29 }
 0x6e6   :  { %1343 = vrot.lane.b32.xlu0 %v3703_v14, %s3535_s11 }
 0x6ea   :  { %1421 = vrot.lane.b32.xlu0 %v3712_v16, %s3535_s11 }
 0x759   :  { %v1122_v46 = vpop.xlane.xlu0 %1121 }
 0x75a   :  { %v1124_v47 = vsub.f32 %v1116_v43, %v1122_v46 }
 0x75c   :  { %v1127_v48 = vmul.f32 1.442695, %v1124_v47 }
 0x75d   :  { %v1216_v49 = vpop.permute.xlu0 %1215 }
 0x75e   :  { %3326 = vpow2.f32 %v1127_v48  ;;  %3247 = vmatpush3.msra.mxu0 %v1216_v49 }
 0x75f   :  { %3257 = vmatprep.subr.mxu0 %v3525_v0 }
 0x761   :  { %v1344_v1 = vpop.permute.xlu0 %1343 }
 0x765   :  { %v1422_v5 = vpop.permute.xlu0 %1421 }
 0x768   :  { %v3327_v50 = vpop.eup %3326 }
 0x769   :  { %v1132_v51 = vsel %vm195_vm2, %v3327_v50, 0.0 }
 0x76a   :  { %1133 = vadd.xlane.f32.xlu1 %v1132_v51 }
 0x77b   :  { %1423 = vrot.lane.b32.xlu1 %v3698_v12, %s3533_s24 }
 0x792   :  { %v905_v52 = vpop.f32.mrb[12].mxu1 }
 0x793   :  { %v3823_v53 = vadd.f32 %v952_v37, %v905_v52  ;;  %v3223_v14 = vpop.f32.mrb[13].mxu1 }
 0x794   :  { %v908_v16 = vpop.f32.mrb[14].mxu1 }
 0x795   :  { %v3825_v54 = vadd.f32 %v955_v39, %v908_v16  ;;  %v3224_v55 = vpop.f32.mrb[15].mxu1 }
 0x79a   :  { %v1033_v56 = vpop.f32.mrb[10].mxu1 }
 0x79b   :  { %v1115_v57 = vsel %vm349_vm3, -1e+09, %v1033_v56  ;;  %v3235_v58 = vpop.f32.mrb[11].mxu1 }
 0x79c   :  { %v1117_v59 = vsel %vm195_vm2, %v1115_v57, -inf }
 0x79f   :  { %1118 = vmax.xlane.f32.xlu1 %v1117_v59 }
 0x7f7   :  { %v1134_v61 = vpop.xlane.xlu1 %1133 }
 0x7f8   :  { %3328 = vrcp.f32 %v1134_v61 }
 0x7fb   :  { %v1424_v2 = vpop.permute.xlu1 %1423 }
 0x802   :  { %v3329_v62 = vpop.eup %3328 }
 0x803   :  { %v1138_v63 = vmul.f32 %v3329_v62, %v3327_v50  ;;  %v1677_v50 = vld [vmem:[#allocation8 + $0xc] sm:$0xf]  ;;  %v1727_v62 = vlaneseq }
 0x804   :  { %v1682_v51 = vsel %vm867_vm5, %v1677_v50, 0 }
 0x805   :  { %3249 = vmatmul.mubr.msk.f32.vlgmr.msra.gmra.mrb[16].mxu0 %vm195_vm2, %v1138_v63  ;;  %v3876_v63 = vshrl.u32 %v1727_v62, 7 }
 0x806   :  { %3258 = vmatpush3.xpose.msk.msra.mxu0 %vm195_vm2, %v1346_v60  ;;  %3259 = vmatprep.mubr.msk.f32.mxu0 %vm3526_vm0, %v3525_v0 }
 0x807   :  { %3262 = vmatprep.subr.mxu0 %v3525_v0 }
 0x809   :  { %3260 = vmatmul.mubr.msk.f32.vlgmr.msra.gmra.mrb[18].mxu0 %vm195_vm2, %v1344_v1  ;;  %v3879_v1 = vsub.s32 0, %v3876_v63 }
 0x80a   :  { %3263 = vmatpush3.xpose.msk.msra.mxu0 %vm195_vm2, %v1424_v2  ;;  %3264 = vmatprep.mubr.msk.f32.mxu0 %vm3526_vm0, %v3525_v0 }
 0x80b   :  { %3272 = vmatprep.subr.mxu0 %v3525_v0 }
 0x80d   :  { %3265 = vmatmul.mubr.msk.f32.vlgmr.msra.gmra.mrb[20].mxu0 %vm195_vm2, %v1422_v5 }
 0x80e   :  { %3274 = vmatprep.mubr.msk.f32.mxu0 %vm3526_vm0, %v3525_v0 }
 0x82c   :  { %v1119_v6 = vpop.xlane.xlu1 %1118 }
 0x82d   :  { %v1123_v7 = vsub.f32 %v1115_v57, %v1119_v6 }
 0x82f   :  { %v1125_v9 = vmul.f32 1.442695, %v1123_v7 }
 0x831   :  { %3330 = vpow2.f32 %v1125_v9 }
 0x83b   :  { %v3331_v10 = vpop.eup %3330 }
 0x83c   :  { %v1129_v11 = vsel %vm195_vm2, %v3331_v10, 0.0 }
 0x83d   :  { %1130 = vadd.xlane.f32.xlu0 %v1129_v11 }
 0x853   :  { %1139 = vrot.lane.b32.xlu0 %v3695_v8, %s3534_s29 }
 0x857   :  { %1599 = vrot.lane.b32.xlu0 %v3698_v12, %s3536_s2 }
 0x8ca   :  { %v1131_v13 = vpop.xlane.xlu0 %1130 }
 0x8cb   :  { %3332 = vrcp.f32 %v1131_v13 }
 0x8ce   :  { %v1140_v15 = vpop.permute.xlu0 %1139 }
 0x8cf   :  { %3242 = vmatpush3.msra.mxu1 %v1140_v15 }
 0x8d0   :  { %3251 = vmatprep.subr.bf16.mxu1 %v3525_v0 }
 0x8d2   :  { %v1600_v19 = vpop.permute.xlu0 %1599 }
 0x8d3   :  { %3273 = vmatpush3.msra.mxu0 %v1600_v19 }
 0x8d5   :  { %v3333_v20 = vpop.eup %3332 }
 0x8d6   :  { %v1137_v21 = vmul.f32 %v3333_v20, %v3331_v10 }
 0x8d8   :  { %3244 = vmatmul.mubr.msk.f32.vlgmr.msra.gmra.mrb[16].mxu1 %vm195_vm2, %v1137_v21  ;;  %v1287_v22 = vpop.f32.mrb[16].mxu0 }
 0x8d9   :  { %v3250_v23 = vpop.f32.mrb[17].mxu0  ;;  %3253 = vmatprep.mubr.msk.bf16.mxu1 %vm3526_vm0, %v3525_v0  ;;  %3252 = vmatpush3.bf16.msra.mxu1 %v1298_v32 }
 0x8da   :  { %3267 = vmatprep.subr.mxu1 %v3525_v0 }
 0x8dc   :  { %v1417_v24 = vpop.f32.mrb[18].mxu0 }
 0x8dd   :  { %v1499_v12 = vsel %vm349_vm3, -1e+09, %v1417_v24  ;;  %v3261_v25 = vpop.f32.mrb[19].mxu0 }
 0x8de   :  { %v1501_v26 = vsel %vm195_vm2, %v1499_v12, -inf }
 0x8df   :  { %1502 = vmax.xlane.f32.xlu1 %v1501_v26 }
 0x8e0   :  { %v1495_v27 = vpop.f32.mrb[20].mxu0 }
 0x8e1   :  { %v1500_v28 = vsel %vm350_vm4, -1e+09, %v1495_v27  ;;  %v3266_v29 = vpop.f32.mrb[21].mxu0 }
 0x8e2   :  { %v1504_v30 = vsel %vm195_vm2, %v1500_v28, -inf }
 0x8e3   :  { %1505 = vmax.xlane.f32.xlu1 %v1504_v30  ;;  %v1775_v30 = vld [vmem:[#allocation10] sm:$0xff] }
 0x96c   :  { %v1503_v17 = vpop.xlane.xlu1 %1502 }
 0x96d   :  { %v1507_v33 = vsub.f32 %v1499_v12, %v1503_v17  ;;  %v1784_v17 = vld [vmem:[#allocation10 + $0x48] sm:$0xff] }
 0x96f   :  { %v1509_v34 = vmul.f32 1.442695, %v1507_v33 }
 0x970   :  { %v1506_v35 = vpop.xlane.xlu1 %1505 }
 0x971   :  { %3334 = vpow2.f32 %v1509_v34  ;;  %v1508_v36 = vsub.f32 %v1500_v28, %v1506_v35  ;;  %v3058_v34 = vcombine.low %v1776_v31, %v1784_v17  ;;  %v3059_v35 = vcombine.high %v1776_v31, %v1784_v17 }
 0x973   :  { %v1511_v37 = vmul.f32 1.442695, %v1508_v36  ;;  %v1791_v36 = vld [vmem:[#allocation10 + $0x80] sm:$0xff] }
 0x975   :  { %3336 = vpow2.f32 %v1511_v37  ;;  %v1799_v37 = vld [vmem:[#allocation10 + $0xc0] sm:$0xff] }
 0x97b   :  { %v3335_v18 = vpop.eup %3334 }
 0x97c   :  { %v1513_v38 = vsel %vm195_vm2, %v3335_v18, 0.0 }
 0x97d   :  { %1514 = vadd.xlane.f32.xlu1 %v1513_v38  ;;  %v3073_v38 = vcombine.high %v1791_v36, %v1799_v37 }
 0x97f   :  { %v3337_v39 = vpop.eup %3336 }
 0x980   :  { %v1516_v40 = vsel %vm195_vm2, %v3337_v39, 0.0 }
 0x981   :  { %1517 = vadd.xlane.f32.xlu1 %v1516_v40  ;;  %v3072_v40 = vcombine.low %v1791_v36, %v1799_v37  ;;  %v1790_v36 = vld [vmem:[#allocation10 + $0x78] sm:$0xff] }
 0x992   :  { %1523 = vrot.lane.b32.xlu1 %v3695_v8, %s3536_s2 }
 0x9ab   :  { %v1211_v41 = vpop.f32.mrb[16].mxu1 }
 0x9ac   :  { %v1291_v42 = vpack.c.bf16 %v1287_v22, %v1211_v41  ;;  %v3245_v43 = vpop.f32.mrb[17].mxu1 }
 0x9ad   :  { %v1777_v43 = vld [vmem:[#allocation10 + $0x10] sm:$0xff] }
 0x9ae   :  { %3254 = vmatmul.mubr.msk.bf16.vlgmr.msra.gmra.mrb[20].mxu1 %vm195_vm2, %v1291_v42 }
 0x9af   :  { %3269 = vmatprep.mubr.msk.f32.mxu1 %vm3526_vm0, %v3525_v0 }
 0xa0a   :  { %v1515_v44 = vpop.xlane.xlu1 %1514 }
 0xa0b   :  { %3338 = vrcp.f32 %v1515_v44  ;;  %v1785_v44 = vld [vmem:[#allocation10 + $0x50] sm:$0xff] }
 0xa0e   :  { %v1518_v45 = vpop.xlane.xlu1 %1517 }
 0xa0f   :  { %3340 = vrcp.f32 %v1518_v45  ;;  %v1778_v45 = vld [vmem:[#allocation10 + $0x18] sm:$0xff] }
 0xa12   :  { %v1524_v46 = vpop.permute.xlu1 %1523 }
 0xa13   :  { %3268 = vmatpush3.msra.mxu1 %v1524_v46  ;;  %v3537_v46 = vmov 0  }
 0xa14   :  { %3277 = vmatprep.subr.bf16.mxu1 %v3525_v0 }
 0xa15   :  { %v3339_v47 = vpop.eup %3338 }
 0xa16   :  { %v1521_v48 = vmul.f32 %v3339_v47, %v3335_v18  ;;  %v1792_v18 = vld [vmem:[#allocation10 + $0x88] sm:$0xff]  ;;  %v3061_v47 = vcombine.high %v1777_v43, %v1785_v44 }
 0xa18   :  { %3270 = vmatmul.mubr.msk.f32.vlgmr.msra.gmra.mrb[18].mxu1 %vm195_vm2, %v1521_v48  ;;  %v1786_v48 = vld [vmem:[#allocation10 + $0x58] sm:$0xff] }
 0xa19   :  { %v3341_v8 = vpop.eup %3340  ;;  %3279 = vmatprep.mubr.msk.bf16.mxu1 %vm3526_vm0, %v3525_v0  ;;  %3278 = vmatpush3.bf16.msra.mxu1 %v1682_v51  ;;  %v3063_v50 = vcombine.high %v1778_v45, %v1786_v48 }
 0xa1a   :  { %v1522_v49 = vmul.f32 %v3341_v8, %v3337_v39  ;;  %2097 = vmatprep.subr.bf16.mxu1 %v3059_v35  ;;  %v1800_v39 = vld [vmem:[#allocation10 + $0xc8] sm:$0xff]  ;;  %v3060_v8 = vcombine.low %v1777_v43, %v1785_v44  ;;  %v1782_v35 = vld [vmem:[#allocation10 + $0x38] sm:$0xff] }
 0xa1b   :  { %v3074_v41 = vcombine.low %v1792_v18, %v1800_v39  ;;  %v3075_v42 = vcombine.high %v1792_v18, %v1800_v39  ;;  %v3071_v39 = vcombine.high %v1782_v35, %v1790_v36  ;;  %v1806_v43 = vld [vmem:[#allocation10 + $0xf8] sm:$0xff] }
 0xa1c   :  { %3275 = vmatmul.mubr.msk.f32.vlgmr.msra.gmra.mrb[22].mxu0 %vm195_vm2, %v1522_v49  ;;  %v3062_v49 = vcombine.low %v1778_v45, %v1786_v48  ;;  %v3070_v45 = vcombine.low %v1782_v35, %v1790_v36 }
 0xa1d   :  { %2086 = vmatprep.mubr.bf16.mxu0 %v3537_v46 }
 0xa81   :  { %v1334_v52 = vpop.f32.mrb[20].mxu1 }
 0xa82   :  { %v1341_v14 = vadd.f32 %v1334_v52, %v3823_v53  ;;  %v3255_v16 = vpop.f32.mrb[21].mxu1  ;;  %v3884_v53 = vld [vmem:[%s4091_s5] sm:$0xf] }
 0xa83   :  { %v1337_v55 = vpop.f32.mrb[22].mxu1 }
 0xa84   :  { %v1342_v56 = vadd.f32 %v1337_v55, %v3825_v54  ;;  %v3256_v57 = vpop.f32.mrb[23].mxu1  ;;  %v1730_v54 = vrot.slane %v3884_v53, %v3879_v1 }
 0xa85   :  { %v3897_v57 = vsub.s32 1, %v3876_v63 }
 0xaeb   :  { %v1595_v58 = vpop.f32.mrb[18].mxu1 }
 0xaec   :  { %v3271_v59 = vpop.f32.mrb[19].mxu1 }
 0xaed   :  { %v3901_v59 = vrot.slane %v3884_v53, %v3897_v57 }
 0xaef   :  { %v1671_v60 = vpop.f32.mrb[22].mxu0 }
 0xaf0   :  { %v1675_v61 = vpack.c.bf16 %v1671_v60, %v1595_v58  ;;  %v3276_v0 = vpop.f32.mrb[23].mxu0  ;;  %v3904_v60 = vsub.s32 2, %v3876_v63 }
 0xaf2   :  { %3280 = vmatmul.mubr.msk.bf16.vlgmr.msra.gmra.mrb[24].mxu1 %vm195_vm2, %v1675_v61  ;;  %v3908_v62 = vrot.slane %v3884_v53, %v3904_v60 }
 0xaf3   :  { %2098 = vmatpush1.bf16.msra.mxu1 %v3058_v34  ;;  %2129 = vmatprep.mubr.bf16.mxu1 %v3537_v46  ;;  %v1789_v34 = vld [vmem:[#allocation10 + $0x70] sm:$0xff] }
 0xaf4   :  { %2099 = vmatprep.subr.bf16.mxu1 %v3075_v42  ;;  %v1798_v42 = vld [vmem:[#allocation10 + $0xb8] sm:$0xff] }
 0xaf5   :  { %v3087_v48 = vcombine.high %v1798_v42, %v1806_v43 }
 0xaf7   :  { %2100 = vmatpush1.bf16.msra.mxu1 %v3074_v41  ;;  %v1805_v41 = vld [vmem:[#allocation10 + $0xf0] sm:$0xff] }
 0xaf8   :  { %2183 = vmatprep.subr.bf16.mxu1 %v3063_v50  ;;  %v2447_v50 = vld [vmem:[#allocation11 + $0x8] sm:$0xff] }
 0xbc5   :  { %v1718_v2 = vpop.f32.mrb[24].mxu1 }
 0xbc6   :  { %v1725_v5 = vadd.f32 %v1718_v2, %v1341_v14  ;;  %v3281_v6 = vpop.f32.mrb[25].mxu1 }
 0xbc7   :  { %v1721_v7 = vpop.f32.mrb[26].mxu1  ;;  %v1793_v6 = vld [vmem:[#allocation10 + $0x90] sm:$0xff] }
 0xbc8   :  { %v1731_v9 = vadd.f32 %v1730_v54, %v1725_v5  ;;  %v1726_v10 = vadd.f32 %v1721_v7, %v1342_v56  ;;  %v3282_v11 = vpop.f32.mrb[27].mxu1  ;;  %v1801_v7 = vld [vmem:[#allocation10 + $0xd0] sm:$0xff] }
 0xbca   :  { %v1732_v13 = vadd.f32 %v1730_v54, %v1726_v10  ;;  %v1733_v15 = vadd.f32 %v1731_v9, %v3681_v3  ;;  %v1794_v9 = vld [vmem:[#allocation10 + $0x98] sm:$0xff] }
 0xbcb   :  { %v1802_v10 = vld [vmem:[#allocation10 + $0xd8] sm:$0xff] }
 0xbcc   :  { %v1735_v19 = vsel %vm143_vm1, %v1733_v15, 0.0  ;;  %v1734_v20 = vadd.f32 %v1732_v13, %v3683_v4  ;;  %v1783_v4 = vld [vmem:[#allocation10 + $0x40] sm:$0xff] }
 0xbcd   :  { %1736 = vadd.xlane.f32.xlu0 %v1735_v19  ;;  %v3057_v32 = vcombine.high %v1775_v30, %v1783_v4  ;;  %v3056_v33 = vcombine.low %v1775_v30, %v1783_v4  ;;  %v3077_v19 = vcombine.high %v1793_v6, %v1801_v7  ;;  %v1804_v30 = vld [vmem:[#allocation10 + $0xe8] sm:$0xff] }
 0xbce   :  { %v1738_v21 = vsel %vm143_vm1, %v1734_v20, 0.0 }
 0xbcf   :  { %1739 = vadd.xlane.f32.xlu1 %v1738_v21  ;;  %2054 = vmatprep.subr.bf16.mxu0 %v3057_v32  ;;  %v1779_v21 = vld [vmem:[#allocation10 + $0x20] sm:$0xff] }
 0xbd0   :  { %2055 = vmatpush1.bf16.msra.mxu0 %v3056_v33  ;;  %v1781_v33 = vld [vmem:[#allocation10 + $0x30] sm:$0xff] }
 0xbd1   :  { %2056 = vmatprep.subr.bf16.mxu0 %v3073_v38  ;;  %v3069_v38 = vcombine.high %v1781_v33, %v1789_v34  ;;  %v3068_v44 = vcombine.low %v1781_v33, %v1789_v34 }
 0xbd4   :  { %2057 = vmatpush1.bf16.msra.mxu0 %v3072_v40  ;;  %v1797_v40 = vld [vmem:[#allocation10 + $0xb0] sm:$0xff] }
 0xbd5   :  { %2140 = vmatprep.subr.bf16.mxu0 %v3061_v47  ;;  %v3085_v47 = vcombine.high %v1797_v40, %v1805_v41 }
 0xc5a   :  { %v1737_v22 = vpop.xlane.xlu0 %1736 }
 0xc5b   :  { %v1742_v23 = vmul.f32 0.03125, %v1737_v22  ;;  %v1787_v22 = vld [vmem:[#allocation10 + $0x60] sm:$0xff] }
 0xc5c   :  { %v1740_v24 = vpop.xlane.xlu1 %1739  ;;  %v3064_v4 = vcombine.low %v1779_v21, %v1787_v22 }
 0xc5d   :  { %v1744_v12 = vsub.f32 %v1733_v15, %v1742_v23  ;;  %v1743_v25 = vmul.f32 0.03125, %v1740_v24  ;;  %v1780_v23 = vld [vmem:[#allocation10 + $0x28] sm:$0xff] }
 0xc5e   :  { %v1788_v24 = vld [vmem:[#allocation10 + $0x68] sm:$0xff] }
 0xc5f   :  { %v1745_v26 = vsub.f32 %v1734_v20, %v1743_v25  ;;  %v1746_v27 = vmul.f32 %v1744_v12, %v1744_v12  ;;  %v3079_v20 = vcombine.high %v1794_v9, %v1802_v10  ;;  %v3078_v25 = vcombine.low %v1794_v9, %v1802_v10  ;;  %v3944_v9 = vld [vmem:[#allocation11 + $0x10] sm:$0xff] }
 0xc60   :  { %v3066_v31 = vcombine.low %v1780_v23, %v1788_v24  ;;  %v3946_v10 = vld [vmem:[#allocation11 + $0x50] sm:$0xff] }
 0xc61   :  { %v1748_v28 = vsel %vm143_vm1, %v1746_v27, 0.0  ;;  %v1747_v29 = vmul.f32 %v1745_v26, %v1745_v26  ;;  %v3067_v27 = vcombine.high %v1780_v23, %v1788_v24  ;;  %v1807_v24 = vld [vmem:[%s4093_s7] sm:$0xff] }
 0xc62   :  { %1749 = vadd.xlane.f32.xlu0 %v1748_v28  ;;  %v1795_v28 = vld [vmem:[#allocation10 + $0xa0] sm:$0xff] }
 0xc63   :  { %v1751_v3 = vsel %vm143_vm1, %v1747_v29, 0.0  ;;  %v1803_v29 = vld [vmem:[#allocation10 + $0xe0] sm:$0xff] }
 0xc64   :  { %v3081_v32 = vcombine.high %v1795_v28, %v1803_v29  ;;  %v3080_v37 = vcombine.low %v1795_v28, %v1803_v29  ;;  %v1829_v29 = vsub.s32 4, %v3876_v63 }
 0xc66   :  { %1752 = vadd.xlane.f32.xlu0 %v1751_v3  ;;  %v1796_v3 = vld [vmem:[#allocation10 + $0xa8] sm:$0xff] }
 0xc67   :  { %v3083_v17 = vcombine.high %v1796_v3, %v1804_v30  ;;  %v3082_v18 = vcombine.low %v1796_v3, %v1804_v30  ;;  %v1837_v3 = vsub.s32 6, %v3876_v63 }
 0xcef   :  { %v1750_v51 = vpop.xlane.xlu0 %1749 }
 0xcf0   :  { %v1754_v52 = vmul.f32 0.03125, %v1750_v51  ;;  %v2455_v51 = vld [vmem:[#allocation11 + $0x48] sm:$0xff] }
 0xcf2   :  { %v1756_v14 = vadd.f32 1e-05, %v1754_v52  ;;  %v3084_v52 = vcombine.low %v1797_v40, %v1805_v41 }
 0xcf3   :  { %v1753_v16 = vpop.xlane.xlu0 %1752 }
 0xcf4   :  { %3342 = vrsqrt.f32 %v1756_v14  ;;  %v1755_v55 = vmul.f32 0.03125, %v1753_v16  ;;  %v3086_v14 = vcombine.low %v1798_v42, %v1806_v43  ;;  %v1830_v43 = vrot.slane %v1807_v24, %v1829_v29 }
 0xcf6   :  { %v1757_v56 = vadd.f32 1e-05, %v1755_v55  ;;  %v3099_v55 = vcombine.high %v2447_v50, %v2455_v51 }
 0xcf8   :  { %3344 = vrsqrt.f32 %v1757_v56 }
 0xcfe   :  { %v3343_v58 = vpop.eup %3342 }
 0xcff   :  { %v1760_v61 = vmul.f32 %v3343_v58, %v1744_v12  ;;  %v3076_v12 = vcombine.low %v1793_v6, %v1801_v7  ;;  %v3098_v58 = vcombine.low %v2447_v50, %v2455_v51 }
 0xd01   :  { %v1766_v54 = vmul.f32 %v3901_v59, %v1760_v61  ;;  %v2462_v61 = vld [vmem:[#allocation11 + $0x80] sm:$0xff] }
 0xd02   :  { %v3345_v0 = vpop.eup %3344 }
 0xd03   :  { %v1761_v2 = vmul.f32 %v3345_v0, %v1745_v26  ;;  %v3913_v11 = vadd.f32 %v3908_v62, %v1766_v54  ;;  %v3065_v26 = vcombine.high %v1779_v21, %v1787_v22  ;;  %v2470_v0 = vld [vmem:[#allocation11 + $0xc0] sm:$0xff]  ;;  %v2463_v54 = vld [vmem:[#allocation11 + $0x88] sm:$0xff]  ;;  %v3100_v21 = vcombine.low %v3944_v9, %v3946_v10 }
 0xd05   :  { %v1767_v5 = vmul.f32 %v3901_v59, %v1761_v2  ;;  %v3113_v2 = vcombine.high %v2462_v61, %v2470_v0 }
 0xd07   :  { %v3916_v13 = vadd.f32 %v3908_v62, %v1767_v5  ;;  %v2471_v5 = vld [vmem:[#allocation11 + $0xc8] sm:$0xff] }
 0xd08   :  { %v3114_v6 = vcombine.low %v2463_v54, %v2471_v5  ;;  %v3115_v7 = vcombine.high %v2463_v54, %v2471_v5  ;;  %v3991_v54 = vld [vmem:[#allocation11 + $0x98] sm:$0xff] }
 0xd09   :  { %v3920_v15 = vpack.c.bf16 %v3916_v13, %v3913_v11 }
 0xd0b   :  { %3088 = vmatmul.mubr.msk.bf16.vlgmr.msra.gmra.mrb[24].mxu0 %vm143_vm1, %v3920_v15  ;;  %3089 = vmatmul.mubr.msk.bf16.vlgmr.msra.gmra.mrb[28].mxu1 %vm143_vm1, %v3920_v15 }
 0xd0c   :  { %2141 = vmatpush1.bf16.msra.mxu0 %v3060_v8  ;;  %2184 = vmatpush1.bf16.msra.mxu1 %v3062_v49  ;;  %v2446_v8 = vld [vmem:[#allocation11] sm:$0xff] }
 0xd0d   :  { %2142 = vmatprep.subr.bf16.mxu0 %v3077_v19  ;;  %2185 = vmatprep.subr.bf16.mxu1 %v3079_v20  ;;  %v2454_v49 = vld [vmem:[#allocation11 + $0x40] sm:$0xff]  ;;  %v3101_v19 = vcombine.high %v3944_v9, %v3946_v10  ;;  %v3952_v20 = vld [vmem:[#allocation11 + $0x58] sm:$0xff] }
 0xd0e   :  { %2172 = vmatprep.mubr.bf16.mxu0 %v3537_v46  ;;  %2215 = vmatprep.mubr.bf16.mxu1 %v3537_v46  ;;  %v3097_v16 = vcombine.high %v2446_v8, %v2454_v49  ;;  %v3096_v56 = vcombine.low %v2446_v8, %v2454_v49  ;;  %v3985_v49 = vld [vmem:[%s4093_s7 + $0x8] sm:$0xff]  ;;  %s3538_s7 = smov [#allocation13]  }
 0xd0f   :  { %s3009_s16 = sshll.u32 %s3538_s7, 4  ;;  %s3010_s16 = int_to_ptr.vmem [resolvable:$true] %s3009_s16 }
 0xd10   :  { %2143 = vmatpush1.bf16.msra.mxu0 %v3076_v12  ;;  %2186 = vmatpush1.bf16.msra.mxu1 %v3078_v25  ;;  %v3964_v12 = vsub.s32 3, %v3876_v63  ;;  %v1814_v25 = vrot.slane %v1807_v24, %v3879_v1  ;;  %s3482_s17 = scalar_lea.vmem %s3010_s16, 256  ;;  %p3487_p7 = scmp.lt.s32.totalorder %s3010_s16, %s3010_s16 }
 0xd11   :  { %2226 = vmatprep.subr.bf16.mxu0 %v3065_v26  ;;  %2269 = vmatprep.subr.bf16.mxu1 %v3067_v27  ;;  %v1822_v26 = vrot.slane %v1807_v24, %v3904_v60  ;;  %v1818_v27 = vrot.slane %v1807_v24, %v3897_v57  ;;  %p3483_p6 = scmp.ne.s32.totalorder %s3010_s16, %s3482_s17  ;;  %p3488_p8 = scmp.lt.s32.totalorder %s3482_s17, %s3482_s17 }
 0xd12   :  { %v1826_v28 = vrot.slane %v1807_v24, %v3964_v12 }
 0xd13   :  { %3090 = vmatmul.mubr.msk.bf16.vlgmr.msra.gmra.mrb[28].mxu0 %vm143_vm1, %v3920_v15  ;;  %3091 = vmatmul.mubr.msk.bf16.vlgmr.msra.gmra.mrb[32].mxu1 %vm143_vm1, %v3920_v15  ;;  %p3489_p9 = por %p3488_p8, %p3487_p7 }
 0xd14   :  { %2227 = vmatpush1.bf16.msra.mxu0 %v3064_v4  ;;  %2270 = vmatpush1.bf16.msra.mxu1 %v3066_v31  ;;  %v1833_v31 = vsub.s32 5, %v3876_v63 }
 0xd15   :  { %2228 = vmatprep.subr.bf16.mxu0 %v3081_v32  ;;  %2271 = vmatprep.subr.bf16.mxu1 %v3083_v17  ;;  %v1841_v32 = vsub.s32 7, %v3876_v63  ;;  %v2475_v63 = vld [vmem:[#allocation11 + $0xe8] sm:$0xff]  ;;  %p3490_p10 = pnand %p3489_p9, %p3483_p6 }
 0xd16   :  { %2258 = vmatprep.mubr.bf16.mxu0 %v3537_v46  ;;  %2301 = vmatprep.mubr.bf16.mxu1 %v3537_v46 }
 0xd17   :  { %v1842_v8 = vrot.slane %v1807_v24, %v1841_v32 }
 0xd18   :  { %2229 = vmatpush1.bf16.msra.mxu0 %v3080_v37  ;;  %2272 = vmatpush1.bf16.msra.mxu1 %v3082_v18 }
 0xd19   :  { %2312 = vmatprep.subr.bf16.mxu0 %v3069_v38  ;;  %2355 = vmatprep.subr.bf16.mxu1 %v3071_v39 }
 0xd1b   :  { %3092 = vmatmul.mubr.msk.bf16.vlgmr.msra.gmra.mrb[32].mxu0 %vm143_vm1, %v3920_v15  ;;  %3093 = vmatmul.mubr.msk.bf16.vlgmr.msra.gmra.mrb[36].mxu1 %vm143_vm1, %v3920_v15 }
 0xd1c   :  { %2313 = vmatpush1.bf16.msra.mxu0 %v3068_v44  ;;  %2356 = vmatpush1.bf16.msra.mxu1 %v3070_v45  ;;  %v1838_v44 = vrot.slane %v1807_v24, %v1837_v3 }
 0xd1d   :  { %2314 = vmatprep.subr.bf16.mxu0 %v3085_v47  ;;  %2357 = vmatprep.subr.bf16.mxu1 %v3087_v48  ;;  %v1834_v48 = vrot.slane %v1807_v24, %v1833_v31  ;;  %v1846_v24 = vrot.slane %v3985_v49, %v3879_v1 }
 0xd1e   :  { %2344 = vmatprep.mubr.bf16.mxu0 %v3537_v46  ;;  %2387 = vmatprep.mubr.bf16.mxu1 %v3537_v46  ;;  %v3112_v46 = vcombine.low %v2462_v61, %v2470_v0 }
 0xd20   :  { %2315 = vmatpush1.bf16.msra.mxu0 %v3084_v52  ;;  %2358 = vmatpush1.bf16.msra.mxu1 %v3086_v14 }
 0xd21   :  { %2642 = vmatprep.subr.bf16.mxu0 %v3097_v16  ;;  %2683 = vmatprep.subr.bf16.mxu1 %v3099_v55  ;;  %v3987_v16 = vld [vmem:[#allocation11 + $0x90] sm:$0xff] }
 0xd22   :  { %v3989_v55 = vld [vmem:[#allocation11 + $0xd0] sm:$0xff] }
 0xd23   :  { %3094 = vmatmul.mubr.msk.bf16.vlgmr.msra.gmra.mrb[36].mxu0 %vm143_vm1, %v3920_v15  ;;  %3095 = vmatmul.mubr.msk.bf16.vlgmr.msra.gmra.mrb[40].mxu1 %vm143_vm1, %v3920_v15  ;;  %v3948_v15 = vld [vmem:[#allocation11 + $0x18] sm:$0xff] }
 0xd24   :  { %v3102_v22 = vcombine.low %v3948_v15, %v3952_v20  ;;  %v3103_v23 = vcombine.high %v3948_v15, %v3952_v20  ;;  %v4019_v15 = vld [vmem:[#allocation11 + $0x68] sm:$0xff] }
 0xd29   :  { %2643 = vmatpush1.bf16.xpose.msra.mxu0 %v3096_v56  ;;  %2684 = vmatpush1.bf16.xpose.msra.mxu1 %v3098_v58 }
 0xd2a   :  { %2644 = vmatprep.subr.bf16.mxu0 %v3113_v2  ;;  %2685 = vmatprep.subr.bf16.mxu1 %v3115_v7  ;;  %v3993_v2 = vld [vmem:[#allocation11 + $0xd8] sm:$0xff] }
 0xd31   :  { %2645 = vmatpush1.bf16.xpose.msra.mxu0 %v3112_v46  ;;  %2686 = vmatpush1.bf16.xpose.msra.mxu1 %v3114_v6 }
 0xd32   :  { %2724 = vmatprep.subr.bf16.mxu0 %v3101_v19  ;;  %2765 = vmatprep.subr.bf16.mxu1 %v3103_v23 }
 0xdde   :  { %v2088_v30 = vpop.f32.mrb[24].mxu0  ;;  %v2131_v4 = vpop.f32.mrb[28].mxu1 }
 0xddf   :  { %v2089_v17 = vadd.f32 %v2088_v30, %v1814_v25  ;;  %v2132_v33 = vadd.f32 %v2131_v4, %v1822_v26  ;;  %v2090_v34 = vpop.f32.mrb[25].mxu0  ;;  %v2133_v35 = vpop.f32.mrb[29].mxu1  ;;  %v3117_v30 = vcombine.high %v3987_v16, %v3989_v55  ;;  %v3119_v4 = vcombine.high %v3991_v54, %v3993_v2 }
 0xde0   :  { %v2091_v36 = vadd.f32 %v2090_v34, %v1818_v27  ;;  %v2134_v37 = vadd.f32 %v2133_v35, %v1826_v28  ;;  %v2092_v18 = vpop.f32.mrb[26].mxu0  ;;  %v2135_v38 = vpop.f32.mrb[30].mxu1 }
 0xde1   :  { %v2093_v39 = vadd.f32 %v2092_v18, %v1814_v25  ;;  %v2136_v40 = vadd.f32 %v2135_v38, %v1822_v26  ;;  %v2094_v41 = vpop.f32.mrb[27].mxu0  ;;  %v2137_v42 = vpop.f32.mrb[31].mxu1  ;;  %v2398_v50 = vmax.f32 %v2089_v17, 0.0  ;;  %v2400_v51 = vmax.f32 %v2132_v33, 0.0 }
 0xde2   :  { %v2095_v45 = vadd.f32 %v2094_v41, %v1818_v27  ;;  %v2138_v47 = vadd.f32 %v2137_v42, %v1826_v28  ;;  %v2399_v56 = vmax.f32 %v2091_v36, 0.0  ;;  %v2401_v58 = vmax.f32 %v2134_v37, 0.0 }
 0xde3   :  { %v2414_v52 = vmax.f32 %v2093_v39, 0.0  ;;  %v2416_v14 = vmax.f32 %v2136_v40, 0.0  ;;  %v1854_v36 = vrot.slane %v3985_v49, %v3904_v60  ;;  %v1850_v39 = vrot.slane %v3985_v49, %v3897_v57  ;;  %v4013_v57 = vld [vmem:[#allocation11 + $0x20] sm:$0xff] }
 0xde4   :  { %v2415_v61 = vmax.f32 %v2095_v45, 0.0  ;;  %v2417_v0 = vmax.f32 %v2138_v47, 0.0  ;;  %v1858_v60 = vrot.slane %v3985_v49, %v3964_v12  ;;  %v4015_v47 = vld [vmem:[#allocation11 + $0x60] sm:$0xff] }
 0xde5   :  { %v2430_v5 = vpack.c.bf16 %v2414_v52, %v2398_v50  ;;  %v2432_v46 = vpack.c.bf16 %v2416_v14, %v2400_v51 }
 0xde6   :  { %v2431_v6 = vpack.c.bf16 %v2415_v61, %v2399_v56  ;;  %v2433_v7 = vpack.c.bf16 %v2417_v0, %v2401_v58  ;;  %v2174_v19 = vpop.f32.mrb[28].mxu0  ;;  %v2217_v23 = vpop.f32.mrb[32].mxu1  ;;  %v3116_v56 = vcombine.low %v3987_v16, %v3989_v55  ;;  %v3118_v58 = vcombine.low %v3991_v54, %v3993_v2 }
 0xde7   :  { %v2175_v25 = vadd.f32 %v2174_v19, %v1830_v43  ;;  %v2218_v26 = vadd.f32 %v2217_v23, %v1838_v44  ;;  %v2176_v27 = vpop.f32.mrb[29].mxu0  ;;  %v2219_v28 = vpop.f32.mrb[33].mxu1  ;;  %v1862_v16 = vrot.slane %v3985_v49, %v1829_v29  ;;  %v1874_v29 = vrot.slane %v3985_v49, %v1841_v32 }
 0xde8   :  { %v2177_v17 = vadd.f32 %v2176_v27, %v1834_v48  ;;  %v2220_v33 = vadd.f32 %v2219_v28, %v1842_v8  ;;  %v2178_v34 = vpop.f32.mrb[30].mxu0  ;;  %v2221_v35 = vpop.f32.mrb[34].mxu1  ;;  %2674 = vmatprep.mubr.bf16.mxu0 %v2431_v6  ;;  %2715 = vmatprep.mubr.bf16.mxu1 %v2433_v7  ;;  %v3105_v6 = vcombine.high %v4013_v57, %v4015_v47 }
 0xde9   :  { %v2179_v1 = vadd.f32 %v2178_v34, %v1830_v43  ;;  %v2222_v37 = vadd.f32 %v2221_v35, %v1838_v44  ;;  %v2180_v18 = vpop.f32.mrb[31].mxu0  ;;  %v2223_v38 = vpop.f32.mrb[35].mxu1  ;;  %2675 = vmatmul.mubr.bf16.vlgmr.msra.gmra.mrb[40].mxu0 %v2430_v5  ;;  %2716 = vmatmul.mubr.bf16.vlgmr.msra.gmra.mrb[44].mxu1 %v2432_v46  ;;  %v2402_v42 = vmax.f32 %v2175_v25, 0.0  ;;  %v2404_v43 = vmax.f32 %v2218_v26, 0.0 }
 0xdea   :  { %v2181_v40 = vadd.f32 %v2180_v18, %v1834_v48  ;;  %v2224_v41 = vadd.f32 %v2223_v38, %v1842_v8  ;;  %2725 = vmatpush1.bf16.xpose.msra.mxu0 %v3100_v21  ;;  %2766 = vmatpush1.bf16.xpose.msra.mxu1 %v3102_v22  ;;  %v2403_v48 = vmax.f32 %v2177_v17, 0.0  ;;  %v2405_v9 = vmax.f32 %v2220_v33, 0.0  ;;  %v4017_v8 = vld [vmem:[#allocation11 + $0x28] sm:$0xff]  ;;  %v2466_v18 = vld [vmem:[#allocation11 + $0xa0] sm:$0xff] }
 0xdeb   :  { %v2418_v44 = vmax.f32 %v2179_v1, 0.0  ;;  %v2420_v45 = vmax.f32 %v2222_v37, 0.0  ;;  %2726 = vmatprep.subr.bf16.mxu0 %v3117_v30  ;;  %2767 = vmatprep.subr.bf16.mxu1 %v3119_v4  ;;  %v3107_v7 = vcombine.high %v4017_v8, %v4019_v15  ;;  %v1870_v28 = vrot.slane %v3985_v49, %v1837_v3 }
 0xdec   :  { %v2419_v10 = vmax.f32 %v2181_v40, 0.0  ;;  %v2421_v21 = vmax.f32 %v2224_v41, 0.0  ;;  %v1866_v30 = vrot.slane %v3985_v49, %v1833_v31  ;;  %v2467_v40 = vld [vmem:[#allocation11 + $0xa8] sm:$0xff] }
 0xded   :  { %v4021_v20 = vpack.c.bf16 %v2418_v44, %v2402_v42  ;;  %v4023_v22 = vpack.c.bf16 %v2420_v45, %v2404_v43  ;;  %v3104_v42 = vcombine.low %v4013_v57, %v4015_v47 }
 0xdee   :  { %v2435_v50 = vpack.c.bf16 %v2419_v10, %v2403_v48  ;;  %v2437_v51 = vpack.c.bf16 %v2421_v21, %v2405_v9  ;;  %v2260_v52 = vpop.f32.mrb[32].mxu0  ;;  %v2303_v14 = vpop.f32.mrb[36].mxu1  ;;  %v3106_v9 = vcombine.low %v4017_v8, %v4019_v15 }
 0xdef   :  { %v2261_v61 = vadd.f32 %v2260_v52, %v1846_v24  ;;  %v2304_v0 = vadd.f32 %v2303_v14, %v1854_v36  ;;  %v2262_v5 = vpop.f32.mrb[33].mxu0  ;;  %v2305_v46 = vpop.f32.mrb[37].mxu1  ;;  %v3123_v14 = vcombine.high %v2467_v40, %v2475_v63 }
 0xdf0   :  { %v2263_v19 = vadd.f32 %v2262_v5, %v1850_v39  ;;  %v2306_v23 = vadd.f32 %v2305_v46, %v1858_v60  ;;  %v2264_v25 = vpop.f32.mrb[34].mxu0  ;;  %v2307_v26 = vpop.f32.mrb[38].mxu1  ;;  %2756 = vmatprep.mubr.bf16.mxu0 %v2435_v50  ;;  %2797 = vmatprep.mubr.bf16.mxu1 %v2437_v51 }
 0xdf1   :  { %v2265_v55 = vadd.f32 %v2264_v25, %v1846_v24  ;;  %v2308_v54 = vadd.f32 %v2307_v26, %v1854_v36  ;;  %v2266_v2 = vpop.f32.mrb[35].mxu0  ;;  %v2309_v27 = vpop.f32.mrb[39].mxu1  ;;  %v2406_v24 = vmax.f32 %v2261_v61, 0.0  ;;  %v2408_v33 = vmax.f32 %v2304_v0, 0.0 }
 0xdf2   :  { %v2267_v4 = vadd.f32 %v2266_v2, %v1850_v39  ;;  %v2310_v17 = vadd.f32 %v2309_v27, %v1858_v60  ;;  %2727 = vmatpush1.bf16.xpose.msra.mxu0 %v3116_v56  ;;  %2768 = vmatpush1.bf16.xpose.msra.mxu1 %v3118_v58  ;;  %v2407_v36 = vmax.f32 %v2263_v19, 0.0  ;;  %v2409_v3 = vmax.f32 %v2306_v23, 0.0  ;;  %v2474_v39 = vld [vmem:[#allocation11 + $0xe0] sm:$0xff] }
 0xdf3   :  { %v2422_v34 = vmax.f32 %v2265_v55, 0.0  ;;  %v2424_v35 = vmax.f32 %v2308_v54, 0.0  ;;  %2806 = vmatprep.subr.bf16.mxu0 %v3105_v6  ;;  %2847 = vmatprep.subr.bf16.mxu1 %v3107_v7  ;;  %v3121_v52 = vcombine.high %v2466_v18, %v2474_v39  ;;  %v2461_v55 = vld [vmem:[#allocation11 + $0x78] sm:$0xff]  ;;  %v3120_v27 = vcombine.low %v2466_v18, %v2474_v39 }
 0xdf4   :  { %v2423_v1 = vmax.f32 %v2267_v4, 0.0  ;;  %v2425_v37 = vmax.f32 %v2310_v17, 0.0  ;;  %v2468_v17 = vld [vmem:[#allocation11 + $0xb0] sm:$0xff]  ;;  %v2481_v18 = vrot.slane %v3884_v53, %v3964_v12 }
 0xdf5   :  { %v4045_v31 = vpack.c.bf16 %v2422_v34, %v2406_v24  ;;  %v4047_v38 = vpack.c.bf16 %v2424_v35, %v2408_v33  ;;  %v2469_v33 = vld [vmem:[#allocation11 + $0xb8] sm:$0xff] }
 0xdf6   :  { %v2439_v41 = vpack.c.bf16 %v2423_v1, %v2407_v36  ;;  %v2441_v32 = vpack.c.bf16 %v2425_v37, %v2409_v3  ;;  %v2346_v49 = vpop.f32.mrb[36].mxu0  ;;  %v2389_v60 = vpop.f32.mrb[40].mxu1  ;;  %v2477_v34 = vld [vmem:[#allocation11 + $0xf8] sm:$0xff] }
 0xdf7   :  { %v2347_v43 = vadd.f32 %v2346_v49, %v1862_v16  ;;  %v2390_v44 = vadd.f32 %v2389_v60, %v1870_v28  ;;  %v2348_v45 = vpop.f32.mrb[37].mxu0  ;;  %v2391_v48 = vpop.f32.mrb[41].mxu1  ;;  %v3127_v3 = vcombine.high %v2469_v33, %v2477_v34  ;;  %v3126_v37 = vcombine.low %v2469_v33, %v2477_v34 }
 0xdf8   :  { %v2349_v10 = vadd.f32 %v2348_v45, %v1866_v30  ;;  %v2392_v21 = vadd.f32 %v2391_v48, %v1874_v29  ;;  %v2350_v50 = vpop.f32.mrb[38].mxu0  ;;  %v2393_v51 = vpop.f32.mrb[42].mxu1 }
 0xdf9   :  { %v2351_v56 = vadd.f32 %v2350_v50, %v1862_v16  ;;  %v2394_v58 = vadd.f32 %v2393_v51, %v1870_v28  ;;  %2757 = vmatmul.mubr.bf16.vlgmr.msra.gmra.mrb[44].mxu0 %v4021_v20  ;;  %2798 = vmatmul.mubr.bf16.vlgmr.msra.gmra.mrb[48].mxu1 %v4023_v22  ;;  %v2352_v57 = vpop.f32.mrb[39].mxu0  ;;  %v2395_v47 = vpop.f32.mrb[43].mxu1  ;;  %v2410_v5 = vmax.f32 %v2347_v43, 0.0  ;;  %v2412_v8 = vmax.f32 %v2390_v44, 0.0  ;;  %v2452_v20 = vld [vmem:[#allocation11 + $0x30] sm:$0xff]  ;;  %v2453_v16 = vld [vmem:[#allocation11 + $0x38] sm:$0xff] }
 0xdfa   :  { %v2353_v61 = vadd.f32 %v2352_v57, %v1866_v30  ;;  %v2396_v0 = vadd.f32 %v2395_v47, %v1874_v29  ;;  %2807 = vmatpush1.bf16.xpose.msra.mxu0 %v3104_v42  ;;  %2838 = vmatprep.mubr.bf16.mxu0 %v2439_v41  ;;  %v2411_v6 = vmax.f32 %v2349_v10, 0.0  ;;  %v2413_v7 = vmax.f32 %v2392_v21, 0.0  ;;  %v2460_v22 = vld [vmem:[#allocation11 + $0x70] sm:$0xff] }
 0xdfb   :  { %v2426_v15 = vmax.f32 %v2351_v56, 0.0  ;;  %v2428_v46 = vmax.f32 %v2394_v58, 0.0  ;;  %2848 = vmatpush1.bf16.xpose.msra.mxu1 %v3106_v9  ;;  %2879 = vmatprep.mubr.bf16.mxu1 %v2441_v32  ;;  %v3122_v28 = vcombine.low %v2467_v40, %v2475_v63  ;;  %v3109_v30 = vcombine.high %v2452_v20, %v2460_v22  ;;  %v2476_v29 = vld [vmem:[#allocation11 + $0xf0] sm:$0xff] }
 0xdfc   :  { %v2427_v19 = vmax.f32 %v2353_v61, 0.0  ;;  %v2429_v23 = vmax.f32 %v2396_v0, 0.0  ;;  %2808 = vmatprep.subr.bf16.mxu0 %v3121_v52  ;;  %2849 = vmatprep.subr.bf16.mxu1 %v3123_v14  ;;  %v3111_v4 = vcombine.high %v2453_v16, %v2461_v55  ;;  %v3108_v24 = vcombine.low %v2452_v20, %v2460_v22 }
 0xdfd   :  { %v2442_v25 = vpack.c.bf16 %v2426_v15, %v2410_v5  ;;  %v2444_v26 = vpack.c.bf16 %v2428_v46, %v2412_v8  ;;  %v3110_v35 = vcombine.low %v2453_v16, %v2461_v55  ;;  %v3125_v36 = vcombine.high %v2468_v17, %v2476_v29 }
 0xdfe   :  { %v2443_v54 = vpack.c.bf16 %v2427_v19, %v2411_v6  ;;  %v2445_v2 = vpack.c.bf16 %v2429_v23, %v2413_v7  ;;  %v3124_v1 = vcombine.low %v2468_v17, %v2476_v29 }
 0xe02   :  { %2809 = vmatpush1.bf16.xpose.msra.mxu0 %v3120_v27 }
 0xe03   :  { %2850 = vmatpush1.bf16.xpose.msra.mxu1 %v3122_v28  ;;  %2888 = vmatprep.subr.bf16.mxu0 %v3109_v30 }
 0xe04   :  { %2929 = vmatprep.subr.bf16.mxu1 %v3111_v4 }
 0xe09   :  { %2839 = vmatmul.mubr.bf16.vlgmr.msra.gmra.mrb[48].mxu0 %v4045_v31 }
 0xe0a   :  { %2880 = vmatmul.mubr.bf16.vlgmr.msra.gmra.mrb[52].mxu1 %v4047_v38  ;;  %2889 = vmatpush1.bf16.xpose.msra.mxu0 %v3108_v24 }
 0xe0b   :  { %2920 = vmatprep.mubr.bf16.mxu0 %v2443_v54  ;;  %2930 = vmatpush1.bf16.xpose.msra.mxu1 %v3110_v35 }
 0xe0c   :  { %2961 = vmatprep.mubr.bf16.mxu1 %v2445_v2  ;;  %2890 = vmatprep.subr.bf16.mxu0 %v3125_v36 }
 0xe0d   :  { %2931 = vmatprep.subr.bf16.mxu1 %v3127_v3 }
 0xe12   :  { %2891 = vmatpush1.bf16.xpose.msra.mxu0 %v3124_v1 }
 0xe13   :  { %2932 = vmatpush1.bf16.xpose.msra.mxu1 %v3126_v37 }
 0xe19   :  { %2921 = vmatmul.mubr.bf16.vlgmr.msra.gmra.mrb[52].mxu0 %v2442_v25 }
 0xe1a   :  { %2962 = vmatmul.mubr.bf16.vlgmr.msra.gmra.mrb[56].mxu1 %v2444_v26 }
 0xebc   :  { %v2676_v39 = vpop.f32.mrb[40].mxu0  ;;  %v2717_v31 = vpop.f32.mrb[44].mxu1 }
 0xebd   :  { %v2677_v40 = vadd.f32 %v2676_v39, %v2481_v18  ;;  %v2678_v63 = vpop.f32.mrb[41].mxu0  ;;  %v2719_v38 = vpop.f32.mrb[45].mxu1 }
 0xebe   :  { %v2679_v41 = vpop.f32.mrb[42].mxu0  ;;  %v2720_v32 = vpop.f32.mrb[46].mxu1 }
 0xebf   :  { %v2718_v49 = vadd.f32 %v2717_v31, %v2677_v40  ;;  %v2680_v60 = vadd.f32 %v2679_v41, %v2481_v18  ;;  %v2681_v42 = vpop.f32.mrb[43].mxu0  ;;  %v2722_v43 = vpop.f32.mrb[47].mxu1 }
 0xec1   :  { %v2721_v44 = vadd.f32 %v2720_v32, %v2680_v60 }
 0xecc   :  { %v2758_v45 = vpop.f32.mrb[44].mxu0  ;;  %v2799_v48 = vpop.f32.mrb[48].mxu1 }
 0xecd   :  { %v2759_v9 = vadd.f32 %v2758_v45, %v2718_v49  ;;  %v2760_v10 = vpop.f32.mrb[45].mxu0  ;;  %v2801_v21 = vpop.f32.mrb[49].mxu1 }
 0xece   :  { %v2761_v50 = vpop.f32.mrb[46].mxu0  ;;  %v2802_v51 = vpop.f32.mrb[50].mxu1 }
 0xecf   :  { %v2800_v53 = vadd.f32 %v2799_v48, %v2759_v9  ;;  %v2762_v12 = vadd.f32 %v2761_v50, %v2721_v44  ;;  %v2763_v52 = vpop.f32.mrb[47].mxu0  ;;  %v2804_v14 = vpop.f32.mrb[51].mxu1 }
 0xed1   :  { %v2803_v56 = vadd.f32 %v2802_v51, %v2762_v12 }
 0xedc   :  { %v2840_v58 = vpop.f32.mrb[48].mxu0 }
 0xedd   :  { %v2841_v57 = vadd.f32 %v2840_v58, %v2800_v53  ;;  %v2881_v47 = vpop.f32.mrb[52].mxu1  ;;  %v2842_v61 = vpop.f32.mrb[49].mxu0 }
 0xede   :  { %v2883_v0 = vpop.f32.mrb[53].mxu1  ;;  %v2843_v5 = vpop.f32.mrb[50].mxu0 }
 0xedf   :  { %v2882_v8 = vadd.f32 %v2881_v47, %v2841_v57  ;;  %v2844_v15 = vadd.f32 %v2843_v5, %v2803_v56  ;;  %v2884_v46 = vpop.f32.mrb[54].mxu1  ;;  %v2845_v6 = vpop.f32.mrb[51].mxu0 }
 0xee0   :  { %v2886_v7 = vpop.f32.mrb[55].mxu1 }
 0xee1   :  { %v2885_v19 = vadd.f32 %v2884_v46, %v2844_v15 }
 0xeec   :  { %v2922_v23 = vpop.f32.mrb[52].mxu0 }
 0xeed   :  { %v2923_v20 = vadd.f32 %v2922_v23, %v2882_v8  ;;  %v2963_v22 = vpop.f32.mrb[56].mxu1  ;;  %v2924_v25 = vpop.f32.mrb[53].mxu0 }
 0xeee   :  { %v2965_v26 = vpop.f32.mrb[57].mxu1  ;;  %v2925_v16 = vpop.f32.mrb[54].mxu0 }
 0xeef   :  { %v2964_v55 = vadd.f32 %v2963_v22, %v2923_v20  ;;  %v2926_v54 = vadd.f32 %v2925_v16, %v2885_v19  ;;  %v2966_v2 = vpop.f32.mrb[58].mxu1  ;;  %v2927_v27 = vpop.f32.mrb[55].mxu0 }
 0xef0   :  { %v2968_v28 = vpop.f32.mrb[59].mxu1 }
 0xef1   :  { %v2967_v30 = vadd.f32 %v2966_v2, %v2926_v54  ;;  %v2970_v4 = vadd.f32 %v2964_v55, %v3913_v11 }
 0xef3   :  { %v2972_v17 = vsel %vm143_vm1, %v2970_v4, 0.0  ;;  %v2971_v29 = vadd.f32 %v2967_v30, %v3916_v13 }
 0xef4   :  { %2973 = vadd.xlane.f32.xlu0 %v2972_v17 }
 0xef5   :  { %v2975_v24 = vsel %vm143_vm1, %v2971_v29, 0.0 }
 0xef8   :  { %2976 = vadd.xlane.f32.xlu0 %v2975_v24 }
 0xf81   :  { %v2974_v33 = vpop.xlane.xlu0 %2973 }
 0xf82   :  { %v2978_v34 = vmul.f32 0.03125, %v2974_v33 }
 0xf84   :  { %v2980_v35 = vsub.f32 %v2970_v4, %v2978_v34 }
 0xf85   :  { %v2977_v36 = vpop.xlane.xlu0 %2976 }
 0xf86   :  { %v2979_v3 = vmul.f32 0.03125, %v2977_v36  ;;  %v2982_v1 = vmul.f32 %v2980_v35, %v2980_v35 }
 0xf88   :  { %v2981_v37 = vsub.f32 %v2971_v29, %v2979_v3  ;;  %v2984_v18 = vsel %vm143_vm1, %v2982_v1, 0.0 }
 0xf89   :  { %2985 = vadd.xlane.f32.xlu1 %v2984_v18 }
 0xf8a   :  { %v2983_v39 = vmul.f32 %v2981_v37, %v2981_v37 }
 0xf8c   :  { %v2987_v11 = vsel %vm143_vm1, %v2983_v39, 0.0 }
 0xf8d   :  { %2988 = vadd.xlane.f32.xlu0 %v2987_v11 }
0x1016   :  { %v2986_v31 = vpop.xlane.xlu1 %2985 }
0x1017   :  { %v2990_v13 = vmul.f32 0.03125, %v2986_v31 }
0x1019   :  { %v2992_v40 = vadd.f32 1e-05, %v2990_v13 }
0x101a   :  { %v2989_v63 = vpop.xlane.xlu0 %2988 }
0x101b   :  { %3346 = vrsqrt.f32 %v2992_v40  ;;  %v2991_v38 = vmul.f32 0.03125, %v2989_v63 }
0x101d   :  { %v2993_v41 = vadd.f32 1e-05, %v2991_v38 }
0x101f   :  { %3348 = vrsqrt.f32 %v2993_v41 }
0x1025   :  { %v3347_v32 = vpop.eup %3346 }
0x1026   :  { %v2996_v49 = vmul.f32 %v3347_v32, %v2980_v35 }
0x1028   :  { %v2998_v60 = vmul.f32 %v2996_v49, %v3901_v59 }
0x1029   :  { %v3349_v42 = vpop.eup %3348 }
0x102a   :  { %v2997_v43 = vmul.f32 %v3349_v42, %v2981_v37  ;;  %v3000_v44 = vadd.f32 %v2998_v60, %v3908_v62 }
0x102c   :  { %v2999_v45 = vmul.f32 %v2997_v43, %v3901_v59  ;;  %3002 = vst.msk [vmem:[#allocation13] sm:$0xff] %vm143_vm1, %v3000_v44 }
0x102e   :  { %v3001_v48 = vadd.f32 %v2999_v45, %v3908_v62 }
0x1030   :  { %3003 = vst.msk [vmem:[#allocation13 + $0x8] sm:$0xff] %vm143_vm1, %v3001_v48 }
0x1031   :  { %3493 = shalt.err (!%p3490_p10)
}
0x1032   :  { %s3494_s0 = scalar_lea.hbm %s4095_s9, 256 }
0x1033   :  { %p3495_p11 = scmp.ne.s32.totalorder %s4095_s9, %s3494_s0  ;;  %p3498_p12 = scmp.lt.u32.totalorder %s3494_s0, %s4095_s9 }
0x1035   :  { %p3500_p13 = pnand %p3498_p12, %p3495_p11 }
0x1037   :  { %3503 = shalt.err (!%p3500_p13)
}
0x1038   :  { %3015 = dma.vmem_to_hbm [thread:$0]  %s3010_s16, 256, %s4095_s9, [#allocation4], %s3515_s19, %s3515_s19, %s3516_s20  }
0x1039   :  { %3512 = dma.done.wait [#allocation4], 256  }
0x103a   :  { %3513 = vsyncadd [#allocation4], 4294967040 }
0x103b   :  { %3019 = vsyncpa [#allocation3], 1 }
0x103c   :  { %3020 = vsyncpa [#allocation6], 1 }
0x103d   :  { %3021 = vsyncpa [#allocation9], 1 }
0x103e   :  { %3022 = vsyncpa [#allocation12], 1 }
0x103f   :  { %3023 = vsyncpa [#allocation4], 1 }

</bundles_post_ra>
